<compile_context>
chip_gen: v7x
topology: tpu7x:2x2x1
jax: 0.10.0
libtpu: 0.0.40
codegen_flags: <defaults>
</compile_context>

<pallas_src>
import functools

import jax
import jax.numpy as jnp
from jax.experimental import pallas as pl
from jax.experimental.pallas import tpu as pltpu

BN_EPS = 1e-5
VMEM_LIMIT_BYTES = 32 * 1024 * 1024   # safe on v5e/v6e (128 MiB) and v7x (64 MiB)
TM_TARGET = 256                       # row-tile target (multiple of 8)


def _pick_row_tile(m, target=TM_TARGET):
    """Largest row tile <= target that is a multiple of 8 and divides m."""
    if m <= target:
        return m
    for t in range(target - target % 8, 7, -8):
        if m % t == 0:
            return t
    return m   # fallback: single whole-array block


# ----------------------------------------------------------------------------
# Pass A kernels: tiled matmul (bf16 operands, f32 acc) + BN statistics
# ----------------------------------------------------------------------------
def _matmul_stats_kernel(x_ref, w_ref, z_ref, st_ref):
    @pl.when(pl.program_id(0) == 0)
    def _init():
        st_ref[...] = jnp.zeros_like(st_ref)

    acc = jnp.dot(x_ref[...], w_ref[...], preferred_element_type=jnp.float32)
    z_ref[...] = acc
    st_ref[0:1, :] = st_ref[0:1, :] + jnp.sum(acc, axis=0, keepdims=True)
    st_ref[1:2, :] = st_ref[1:2, :] + jnp.sum(acc * acc, axis=0, keepdims=True)


def _dual_matmul_stats_kernel(a_ref, wa_ref, b_ref, wb_ref,
                              za_ref, zb_ref, sta_ref, stb_ref):
    # conv3 matmul and projection-shortcut matmul fused (they share row tiles).
    @pl.when(pl.program_id(0) == 0)
    def _init():
        sta_ref[...] = jnp.zeros_like(sta_ref)
        stb_ref[...] = jnp.zeros_like(stb_ref)

    za = jnp.dot(a_ref[...], wa_ref[...], preferred_element_type=jnp.float32)
    zb = jnp.dot(b_ref[...], wb_ref[...], preferred_element_type=jnp.float32)
    za_ref[...] = za
    zb_ref[...] = zb
    sta_ref[0:1, :] = sta_ref[0:1, :] + jnp.sum(za, axis=0, keepdims=True)
    sta_ref[1:2, :] = sta_ref[1:2, :] + jnp.sum(za * za, axis=0, keepdims=True)
    stb_ref[0:1, :] = stb_ref[0:1, :] + jnp.sum(zb, axis=0, keepdims=True)
    stb_ref[1:2, :] = stb_ref[1:2, :] + jnp.sum(zb * zb, axis=0, keepdims=True)


def matmul_with_stats(x2d, w):
    M, K = x2d.shape
    K2, C = w.shape
    assert K == K2
    tm = _pick_row_tile(M)
    cost = pl.CostEstimate(
        flops=int(2 * M * K * C), transcendentals=0,
        bytes_accessed=int(x2d.size * x2d.dtype.itemsize
                           + w.size * w.dtype.itemsize + M * C * 4 + 2 * C * 4))
    return pl.pallas_call(
        _matmul_stats_kernel,
        out_shape=(jax.ShapeDtypeStruct((M, C), jnp.float32),
                   jax.ShapeDtypeStruct((2, C), jnp.float32)),
        grid=(M // tm,),
        in_specs=[pl.BlockSpec((tm, K), lambda i: (i, 0)),
                  pl.BlockSpec((K, C), lambda i: (0, 0))],
        out_specs=(pl.BlockSpec((tm, C), lambda i: (i, 0)),
                   pl.BlockSpec((2, C), lambda i: (0, 0))),
        compiler_params=pltpu.CompilerParams(
            dimension_semantics=("arbitrary",),          # stats carried across tiles
            vmem_limit_bytes=VMEM_LIMIT_BYTES),
        cost_estimate=cost,
    )(x2d, w)


def dual_matmul_with_stats(a2d, wa, b2d, wb):
    M, Ka = a2d.shape
    Mb, Kb = b2d.shape
    assert M == Mb
    C = wa.shape[1]
    assert wb.shape[1] == C
    tm = _pick_row_tile(M)
    cost = pl.CostEstimate(
        flops=int(2 * M * (Ka + Kb) * C), transcendentals=0,
        bytes_accessed=int(a2d.size * a2d.dtype.itemsize
                           + b2d.size * b2d.dtype.itemsize
                           + wa.size * wa.dtype.itemsize
                           + wb.size * wb.dtype.itemsize
                           + 2 * M * C * 4 + 4 * C * 4))
    return pl.pallas_call(
        _dual_matmul_stats_kernel,
        out_shape=(jax.ShapeDtypeStruct((M, C), jnp.float32),
                   jax.ShapeDtypeStruct((M, C), jnp.float32),
                   jax.ShapeDtypeStruct((2, C), jnp.float32),
                   jax.ShapeDtypeStruct((2, C), jnp.float32)),
        grid=(M // tm,),
        in_specs=[pl.BlockSpec((tm, Ka), lambda i: (i, 0)),
                  pl.BlockSpec((Ka, C), lambda i: (0, 0)),
                  pl.BlockSpec((tm, Kb), lambda i: (i, 0)),
                  pl.BlockSpec((Kb, C), lambda i: (0, 0))],
        out_specs=(pl.BlockSpec((tm, C), lambda i: (i, 0)),
                   pl.BlockSpec((tm, C), lambda i: (i, 0)),
                   pl.BlockSpec((2, C), lambda i: (0, 0)),
                   pl.BlockSpec((2, C), lambda i: (0, 0))),
        compiler_params=pltpu.CompilerParams(
            dimension_semantics=("arbitrary",),
            vmem_limit_bytes=VMEM_LIMIT_BYTES),
        cost_estimate=cost,
    )(a2d, wa, b2d, wb)


# ----------------------------------------------------------------------------
# Pass B kernel: tiled BN normalize + affine (+ residual [optionally BN'd]) + ReLU
# ----------------------------------------------------------------------------
def _make_bn_finalize_kernel(num_rows, apply_relu, res_kind):
    inv_m = 1.0 / float(num_rows)

    def _bn(z, st_ref, g_ref, b_ref):
        mean = st_ref[0:1, :] * inv_m
        var = jnp.maximum(st_ref[1:2, :] * inv_m - mean * mean, 0.0)
        scale = jax.lax.rsqrt(var + BN_EPS) * g_ref[...]     # rsqrt -> EUP slot
        shift = b_ref[...] - mean * scale
        return z * scale + shift                              # f32 epilogue (v5e-safe)

    def kernel(*refs):
        if res_kind is None:
            z_ref, st_ref, g_ref, b_ref, o_ref = refs
            res = None
        elif res_kind == "raw":
            z_ref, st_ref, g_ref, b_ref, r_ref, o_ref = refs
            res = r_ref[...].astype(jnp.float32)
        else:  # "bn": projection shortcut with its own train-mode BN
            (z_ref, st_ref, g_ref, b_ref,
             zr_ref, str_ref, gr_ref, br_ref, o_ref) = refs
            res = _bn(zr_ref[...].astype(jnp.float32), str_ref, gr_ref, br_ref)

        y = _bn(z_ref[...].astype(jnp.float32), st_ref, g_ref, b_ref)
        if res is not None:
            y = y + res
        if apply_relu:
            y = jnp.maximum(y, 0.0)
        o_ref[...] = y.astype(o_ref.dtype)

    return kernel


def bn_finalize(z, stats, gamma, beta, *, relu, out_dtype=jnp.float32,
                residual=None, res_stats=None, res_gamma=None, res_beta=None):
    M, C = z.shape
    tm = _pick_row_tile(M)
    g2 = gamma.reshape(1, C).astype(jnp.float32)
    b2 = beta.reshape(1, C).astype(jnp.float32)

    if residual is None:
        res_kind = None
    elif res_stats is None:
        res_kind = "raw"
    else:
        res_kind = "bn"

    inputs = [z, stats, g2, b2]
    in_specs = [pl.BlockSpec((tm, C), lambda i: (i, 0)),
                pl.BlockSpec((2, C), lambda i: (0, 0)),
                pl.BlockSpec((1, C), lambda i: (0, 0)),
                pl.BlockSpec((1, C), lambda i: (0, 0))]
    if res_kind == "raw":
        inputs.append(residual)
        in_specs.append(pl.BlockSpec((tm, C), lambda i: (i, 0)))
    elif res_kind == "bn":
        gr2 = res_gamma.reshape(1, C).astype(jnp.float32)
        br2 = res_beta.reshape(1, C).astype(jnp.float32)
        inputs += [residual, res_stats, gr2, br2]
        in_specs += [pl.BlockSpec((tm, C), lambda i: (i, 0)),
                     pl.BlockSpec((2, C), lambda i: (0, 0)),
                     pl.BlockSpec((1, C), lambda i: (0, 0)),
                     pl.BlockSpec((1, C), lambda i: (0, 0))]

    bytes_accessed = int(sum(a.size * a.dtype.itemsize for a in inputs)
                         + M * C * jnp.dtype(out_dtype).itemsize)
    cost = pl.CostEstimate(flops=int(8 * M * C), transcendentals=int(2 * C),
                           bytes_accessed=bytes_accessed)

    kernel = _make_bn_finalize_kernel(M, relu, res_kind)
    return pl.pallas_call(
        kernel,
        out_shape=jax.ShapeDtypeStruct((M, C), out_dtype),
        grid=(M // tm,),
        in_specs=in_specs,
        out_specs=pl.BlockSpec((tm, C), lambda i: (i, 0)),
        compiler_params=pltpu.CompilerParams(
            dimension_semantics=("parallel",),            # megacore on v7x
            vmem_limit_bytes=VMEM_LIMIT_BYTES),
        cost_estimate=cost,
    )(*inputs)


# ----------------------------------------------------------------------------
# Glue: im2col for the 3x3 / padding=1 / stride conv (plain JAX, bf16)
# ----------------------------------------------------------------------------
def im2col_3x3(x_nhwc, stride):
    # TODO(synk): fuse the halo'd / strided patch gather into the conv2 kernel
    # (polyphase or manual DMA) to avoid materializing the inflated patch
    # tensor in HBM; kept as JAX glue here (bf16, streamed tile-by-tile into
    # the tiled matmul kernel) for robust lowering.
    N, H, W, C = x_nhwc.shape
    xp = jnp.pad(x_nhwc, ((0, 0), (1, 1), (1, 1), (0, 0)))
    Ho = (H + 2 - 3) // stride + 1
    Wo = (W + 2 - 3) // stride + 1
    cols = []
    for dy in range(3):
        for dx in range(3):
            patch = xp[:, dy:dy + stride * (Ho - 1) + 1:stride,
                          dx:dx + stride * (Wo - 1) + 1:stride, :]
            cols.append(patch)
    patches = jnp.concatenate(cols, axis=-1)          # (N, Ho, Wo, 9*C)
    return patches.reshape(N * Ho * Wo, 9 * C), (N, Ho, Wo)


# ----------------------------------------------------------------------------
# Bottleneck forward (matches the PyTorch module semantics, train-mode BN)
# ----------------------------------------------------------------------------
def bottleneck_forward(x_nhwc, params, stride):
    N, H, W, Cin = x_nhwc.shape
    planes = params["w1"].shape[1]
    Cout = params["w3"].shape[1]               # expansion * planes

    # bf16 MXU operands (f32 accumulation inside the kernels) -> MXU peak rate
    # and halved HBM traffic for activations / weights.  BN math stays f32.
    w1 = params["w1"].astype(jnp.bfloat16)
    w2 = params["w2"].reshape(9 * planes, planes).astype(jnp.bfloat16)
    w3 = params["w3"].astype(jnp.bfloat16)

    # ---- conv1 (1x1) + bn1 + relu ------------------------------------------
    x2d = x_nhwc.reshape(N * H * W, Cin).astype(jnp.bfloat16)
    z1, st1 = matmul_with_stats(x2d, w1)
    y1 = bn_finalize(z1, st1, params["g1"], params["b1"], relu=True,
                     out_dtype=jnp.bfloat16)
    y1 = y1.reshape(N, H, W, planes)

    # ---- conv2 (3x3, stride, pad=1) + bn2 + relu ---------------------------
    p2d, (_, Ho, Wo) = im2col_3x3(y1, stride)
    z2, st2 = matmul_with_stats(p2d, w2)
    y2 = bn_finalize(z2, st2, params["g2"], params["b2"], relu=True,
                     out_dtype=jnp.bfloat16)

    # ---- conv3 (1x1) + bn3, (+ shortcut), final relu -----------------------
    if stride != 1 or Cin != Cout:
        # Projection shortcut shares the conv3 output rows: both matmuls (+ BN
        # stats) run in ONE pass-A kernel; both BNs + residual add + ReLU are
        # fused in ONE pass-B kernel.
        # TODO(synk): the spatial subsampling below could be folded into the
        # kernel's DMA (strided fetch) instead of a JAX-level gather.
        ws = params["ws"].astype(jnp.bfloat16)
        xs = x_nhwc[:, ::stride, ::stride, :].reshape(N * Ho * Wo, Cin)
        xs = xs.astype(jnp.bfloat16)
        z3, zs, st3, sts = dual_matmul_with_stats(y2, w3, xs, ws)
        out = bn_finalize(z3, st3, params["g3"], params["b3"], relu=True,
                          residual=zs, res_stats=sts,
                          res_gamma=params["gs"], res_beta=params["bs"],
                          out_dtype=jnp.float32)
    else:
        z3, st3 = matmul_with_stats(y2, w3)
        identity = x_nhwc.reshape(N * H * W, Cin).astype(jnp.float32)
        out = bn_finalize(z3, st3, params["g3"], params["b3"], relu=True,
                          residual=identity, out_dtype=jnp.float32)

    return out.reshape(N, Ho, Wo, Cout)


# ----------------------------------------------------------------------------
# Pure-JAX (f32) reference, same semantics as the PyTorch module in train mode
# ----------------------------------------------------------------------------
def _bn_train_ref(z2d, g, b):
    m = jnp.mean(z2d, axis=0, keepdims=True)
    v = jnp.mean(jnp.square(z2d - m), axis=0, keepdims=True)
    return (z2d - m) * jax.lax.rsqrt(v + BN_EPS) * g.reshape(1, -1) + b.reshape(1, -1)


def reference_forward(x_nhwc, params, stride):
    N, H, W, Cin = x_nhwc.shape
    planes = params["w1"].shape[1]
    Cout = params["w3"].shape[1]
    x2d = x_nhwc.reshape(N * H * W, Cin)
    y1 = jnp.maximum(_bn_train_ref(x2d @ params["w1"], params["g1"], params["b1"]), 0.0)
    y1 = y1.reshape(N, H, W, planes)
    p2d, (_, Ho, Wo) = im2col_3x3(y1, stride)
    y2 = jnp.maximum(_bn_train_ref(p2d @ params["w2"].reshape(9 * planes, planes),
                                   params["g2"], params["b2"]), 0.0)
    z3 = _bn_train_ref(y2 @ params["w3"], params["g3"], params["b3"])
    if stride != 1 or Cin != Cout:
        xs = x_nhwc[:, ::stride, ::stride, :].reshape(N * Ho * Wo, Cin)
        sc = _bn_train_ref(xs @ params["ws"], params["gs"], params["bs"])
    else:
        sc = x2d
    out = jnp.maximum(z3 + sc, 0.0)
    return out.reshape(N, Ho, Wo, Cout)


# ----------------------------------------------------------------------------
# Deterministic parameter construction (shapes per Bottleneck.__init__)
# ----------------------------------------------------------------------------
def init_params(key, in_planes, planes, stride, expansion=4):
    cout = expansion * planes
    k = jax.random.split(key, 4)
    params = {
        "w1": 0.2 * jax.random.normal(k[0], (in_planes, planes), jnp.float32),
        "w2": 0.1 * jax.random.normal(k[1], (3, 3, planes, planes), jnp.float32),
        "w3": 0.2 * jax.random.normal(k[2], (planes, cout), jnp.float32),
        "g1": jnp.ones((planes,), jnp.float32), "b1": jnp.zeros((planes,), jnp.float32),
        "g2": jnp.ones((planes,), jnp.float32), "b2": jnp.zeros((planes,), jnp.float32),
        "g3": jnp.ones((cout,), jnp.float32), "b3": jnp.zeros((cout,), jnp.float32),
    }
    if stride != 1 or in_planes != cout:
        params["ws"] = 0.2 * jax.random.normal(k[3], (in_planes, cout), jnp.float32)
        params["gs"] = jnp.ones((cout,), jnp.float32)
        params["bs"] = jnp.zeros((cout,), jnp.float32)
    return params


if __name__ == "__main__":
    key = jax.random.PRNGKey(0)
    k_x, k_p = jax.random.split(key)

    # Small shapes consistent with the module: N=2, in_planes=16, planes=8,
    # stride=2, 16x16 spatial -> output (2, 8, 8, 32) in NHWC.
    N, H, W = 2, 16, 16
    in_planes, planes, stride = 16, 8, 2

    x_nchw = jax.random.normal(k_x, (N, in_planes, H, W), jnp.float32)
    x_nhwc = jnp.transpose(x_nchw, (0, 2, 3, 1))   # NCHW -> NHWC

    params = init_params(k_p, in_planes, planes, stride)

    forward = jax.jit(functools.partial(bottleneck_forward, stride=stride))
    out = jax.block_until_ready(forward(x_nhwc, params))

    expected_shape = (N, (H + 2 - 3) // stride + 1, (W + 2 - 3) // stride + 1, 4 * planes)
    assert out.shape == expected_shape, (out.shape, expected_shape)
    assert bool(jnp.all(out >= 0.0))   # final ReLU

    # Numerical check against an f32 pure-JAX reference (bf16 MXU operands in
    # the kernel path -> generous tolerance).
    ref = reference_forward(x_nhwc, params, stride)
    max_diff = float(jnp.max(jnp.abs(out - ref)))
    assert max_diff < 0.35, f"max |kernel - reference| = {max_diff}"

    print("KERNEL_OK")
</pallas_src>

<mosaic_0001>
module attributes {stable_mosaic.version = 11 : i64} {
  func.func @kernel(%arg0: i32, %arg1: memref<256x8xf32, #tpu.memory_space<vmem>>, %arg2: memref<2x8xf32, #tpu.memory_space<vmem>>, %arg3: memref<1x8xf32, #tpu.memory_space<vmem>>, %arg4: memref<1x8xf32, #tpu.memory_space<vmem>>, %arg5: memref<256x8xbf16, #tpu.memory_space<vmem>>) attributes {dimension_semantics = [#tpu.dimension_semantics<parallel>], iteration_bounds = array<i64: 2>, scalar_prefetch = 0 : i64, scratch_operands = 0 : i64, tpu.core_type = #tpu.core_type<tc>, window_params = [{transform_indices = @transform_0, window_bounds = array<i64: 256, 8>}, {pipeline_mode = #tpu.pipeline_mode<synchronous>, transform_indices = @transform_1, window_bounds = array<i64: 2, 8>}, {pipeline_mode = #tpu.pipeline_mode<synchronous>, transform_indices = @transform_2, window_bounds = array<i64: 1, 8>}, {pipeline_mode = #tpu.pipeline_mode<synchronous>, transform_indices = @transform_3, window_bounds = array<i64: 1, 8>}, {transform_indices = @transform_4, window_bounds = array<i64: 256, 8>}]} {
    %c0 = arith.constant 0 : index
    %c0_0 = arith.constant 0 : index
    %0 = vector.load %arg1[%c0, %c0_0] : memref<256x8xf32, #tpu.memory_space<vmem>>, vector<256x8xf32>
    %c0_1 = arith.constant 0 : index
    %c0_2 = arith.constant 0 : index
    %1 = vector.load %arg2[%c0_1, %c0_2] : memref<2x8xf32, #tpu.memory_space<vmem>>, vector<1x8xf32>
    %cst = arith.constant 0.001953125 : f32
    %2 = vector.broadcast %cst : f32 to vector<1x8xf32>
    %3 = arith.mulf %1, %2 : vector<1x8xf32>
    %c1 = arith.constant 1 : index
    %c0_3 = arith.constant 0 : index
    %4 = vector.load %arg2[%c1, %c0_3] : memref<2x8xf32, #tpu.memory_space<vmem>>, vector<1x8xf32>
    %cst_4 = arith.constant 0.001953125 : f32
    %5 = vector.broadcast %cst_4 : f32 to vector<1x8xf32>
    %6 = arith.mulf %4, %5 : vector<1x8xf32>
    %7 = arith.mulf %3, %3 : vector<1x8xf32>
    %8 = arith.subf %6, %7 : vector<1x8xf32>
    %cst_5 = arith.constant 0.000000e+00 : f32
    %9 = vector.broadcast %cst_5 : f32 to vector<1x8xf32>
    %10 = arith.maximumf %8, %9 : vector<1x8xf32>
    %cst_6 = arith.constant 9.99999974E-6 : f32
    %11 = vector.broadcast %cst_6 : f32 to vector<1x8xf32>
    %12 = arith.addf %10, %11 : vector<1x8xf32>
    %13 = math.rsqrt %12 : vector<1x8xf32>
    %c0_7 = arith.constant 0 : index
    %c0_8 = arith.constant 0 : index
    %14 = vector.load %arg3[%c0_7, %c0_8] : memref<1x8xf32, #tpu.memory_space<vmem>>, vector<1x8xf32>
    %15 = arith.mulf %13, %14 : vector<1x8xf32>
    %c0_9 = arith.constant 0 : index
    %c0_10 = arith.constant 0 : index
    %16 = vector.load %arg4[%c0_9, %c0_10] : memref<1x8xf32, #tpu.memory_space<vmem>>, vector<1x8xf32>
    %17 = arith.mulf %3, %15 : vector<1x8xf32>
    %18 = arith.subf %16, %17 : vector<1x8xf32>
    %19 = vector.broadcast %15 : vector<1x8xf32> to vector<256x8xf32>
    %20 = arith.mulf %0, %19 : vector<256x8xf32>
    %21 = vector.broadcast %18 : vector<1x8xf32> to vector<256x8xf32>
    %22 = arith.addf %20, %21 : vector<256x8xf32>
    %cst_11 = arith.constant 0.000000e+00 : f32
    %23 = vector.broadcast %cst_11 : f32 to vector<256x8xf32>
    %24 = arith.maximumf %22, %23 : vector<256x8xf32>
    %25 = arith.truncf %24 : vector<256x8xf32> to vector<256x8xbf16>
    %c0_12 = arith.constant 0 : index
    %c0_13 = arith.constant 0 : index
    %26 = vector.load %arg5[%c0_12, %c0_13] : memref<256x8xbf16, #tpu.memory_space<vmem>>, vector<256x8xbf16>
    tpu.vector_store %arg5[%c0_12, %c0_13], %25 {strides = array<i32>} : memref<256x8xbf16, #tpu.memory_space<vmem>>, vector<256x8xbf16>,
    return
  }
  func.func @transform_0(%arg0: i32) -> (i32, i32) {
    %c0_i32 = arith.constant 0 : i32
    %c0_i32_0 = arith.constant 0 : i32
    return %arg0, %c0_i32 : i32, i32
  }
  func.func @transform_1(%arg0: i32) -> (i32, i32) {
    %c0_i32 = arith.constant 0 : i32
    %c0_i32_0 = arith.constant 0 : i32
    %c0_i32_1 = arith.constant 0 : i32
    return %c0_i32, %c0_i32_0 : i32, i32
  }
  func.func @transform_2(%arg0: i32) -> (i32, i32) {
    %c0_i32 = arith.constant 0 : i32
    %c0_i32_0 = arith.constant 0 : i32
    %c0_i32_1 = arith.constant 0 : i32
    return %c0_i32, %c0_i32_0 : i32, i32
  }
  func.func @transform_3(%arg0: i32) -> (i32, i32) {
    %c0_i32 = arith.constant 0 : i32
    %c0_i32_0 = arith.constant 0 : i32
    %c0_i32_1 = arith.constant 0 : i32
    return %c0_i32, %c0_i32_0 : i32, i32
  }
  func.func @transform_4(%arg0: i32) -> (i32, i32) {
    %c0_i32 = arith.constant 0 : i32
    %c0_i32_0 = arith.constant 0 : i32
    return %arg0, %c0_i32 : i32, i32
  }
}

module attributes {stable_mosaic.version = 11 : i64} {
  func.func @_matmul_stats_kernel(%arg0: i32, %arg1: memref<256x16xbf16, #tpu.memory_space<vmem>>, %arg2: memref<16x8xbf16, #tpu.memory_space<vmem>>, %arg3: memref<256x8xf32, #tpu.memory_space<vmem>>, %arg4: memref<2x8xf32, #tpu.memory_space<vmem>>) attributes {dimension_semantics = [#tpu.dimension_semantics<arbitrary>], iteration_bounds = array<i64: 2>, scalar_prefetch = 0 : i64, scratch_operands = 0 : i64, tpu.core_type = #tpu.core_type<tc>, window_params = [{transform_indices = @transform_0, window_bounds = array<i64: 256, 16>}, {pipeline_mode = #tpu.pipeline_mode<synchronous>, transform_indices = @transform_1, window_bounds = array<i64: 16, 8>}, {transform_indices = @transform_2, window_bounds = array<i64: 256, 8>}, {pipeline_mode = #tpu.pipeline_mode<synchronous>, transform_indices = @transform_3, window_bounds = array<i64: 2, 8>}]} {
    %c0_i32 = arith.constant 0 : i32
    %0 = arith.cmpi eq, %arg0, %c0_i32 : i32
    %1 = arith.extui %0 : i1 to i32
    %c0_i32_0 = arith.constant 0 : i32
    %2 = arith.cmpi ne, %1, %c0_i32_0 : i32
    scf.if %2 {
      %cst_15 = arith.constant 0.000000e+00 : f32
      %18 = vector.broadcast %cst_15 : f32 to vector<2x8xf32>
      %c0_16 = arith.constant 0 : index
      %c0_17 = arith.constant 0 : index
      %19 = vector.load %arg4[%c0_16, %c0_17] : memref<2x8xf32, #tpu.memory_space<vmem>>, vector<2x8xf32>
      tpu.vector_store %arg4[%c0_16, %c0_17], %18 {strides = array<i32>} : memref<2x8xf32, #tpu.memory_space<vmem>>, vector<2x8xf32>,
    } else {
    }
    %c0 = arith.constant 0 : index
    %c0_1 = arith.constant 0 : index
    %3 = vector.load %arg1[%c0, %c0_1] : memref<256x16xbf16, #tpu.memory_space<vmem>>, vector<256x16xbf16>
    %c0_2 = arith.constant 0 : index
    %c0_3 = arith.constant 0 : index
    %4 = vector.load %arg2[%c0_2, %c0_3] : memref<16x8xbf16, #tpu.memory_space<vmem>>, vector<16x8xbf16>
    %cst = arith.constant dense<0.000000e+00> : vector<256x8xf32>
    %5 = tpu.matmul %3, %4, %cst {dimension_numbers = #tpu.dot_dimension_numbers<[1], [0], [0], [1], [0, 0, 1, 1], [], []>} : vector<256x16xbf16>, vector<16x8xbf16>, vector<256x8xf32> -> vector<256x8xf32>
    %c0_4 = arith.constant 0 : index
    %c0_5 = arith.constant 0 : index
    %6 = vector.load %arg3[%c0_4, %c0_5] : memref<256x8xf32, #tpu.memory_space<vmem>>, vector<256x8xf32>
    tpu.vector_store %arg3[%c0_4, %c0_5], %5 {strides = array<i32>} : memref<256x8xf32, #tpu.memory_space<vmem>>, vector<256x8xf32>,
    %c0_6 = arith.constant 0 : index
    %c0_7 = arith.constant 0 : index
    %7 = vector.load %arg4[%c0_6, %c0_7] : memref<2x8xf32, #tpu.memory_space<vmem>>, vector<1x8xf32>
    %cst_8 = arith.constant dense<0.000000e+00> : vector<8xf32>
    %8 = vector.multi_reduction <add>, %5, %cst_8 [0] : vector<256x8xf32> to vector<8xf32>
    %9 = vector.shape_cast %8 : vector<8xf32> to vector<1x8xf32>
    %10 = arith.addf %7, %9 : vector<1x8xf32>
    %c0_9 = arith.constant 0 : index
    %c0_10 = arith.constant 0 : index
    %11 = vector.load %arg4[%c0_9, %c0_10] : memref<2x8xf32, #tpu.memory_space<vmem>>, vector<1x8xf32>
    tpu.vector_store %arg4[%c0_9, %c0_10], %10 {strides = array<i32>} : memref<2x8xf32, #tpu.memory_space<vmem>>, vector<1x8xf32>,
    %c1 = arith.constant 1 : index
    %c0_11 = arith.constant 0 : index
    %12 = vector.load %arg4[%c1, %c0_11] : memref<2x8xf32, #tpu.memory_space<vmem>>, vector<1x8xf32>
    %13 = arith.mulf %5, %5 : vector<256x8xf32>
    %cst_12 = arith.constant dense<0.000000e+00> : vector<8xf32>
    %14 = vector.multi_reduction <add>, %13, %cst_12 [0] : vector<256x8xf32> to vector<8xf32>
    %15 = vector.shape_cast %14 : vector<8xf32> to vector<1x8xf32>
    %16 = arith.addf %12, %15 : vector<1x8xf32>
    %c1_13 = arith.constant 1 : index
    %c0_14 = arith.constant 0 : index
    %17 = vector.load %arg4[%c1_13, %c0_14] : memref<2x8xf32, #tpu.memory_space<vmem>>, vector<1x8xf32>
    tpu.vector_store %arg4[%c1_13, %c0_14], %16 {strides = array<i32>} : memref<2x8xf32, #tpu.memory_space<vmem>>, vector<1x8xf32>,
    return
  }
  func.func @transform_0(%arg0: i32) -> (i32, i32) {
    %c0_i32 = arith.constant 0 : i32
    %c0_i32_0 = arith.constant 0 : i32
    return %arg0, %c0_i32 : i32, i32
  }
  func.func @transform_1(%arg0: i32) -> (i32, i32) {
    %c0_i32 = arith.constant 0 : i32
    %c0_i32_0 = arith.constant 0 : i32
    %c0_i32_1 = arith.constant 0 : i32
    return %c0_i32, %c0_i32_0 : i32, i32
  }
  func.func @transform_2(%arg0: i32) -> (i32, i32) {
    %c0_i32 = arith.constant 0 : i32
    %c0_i32_0 = arith.constant 0 : i32
    return %arg0, %c0_i32 : i32, i32
  }
  func.func @transform_3(%arg0: i32) -> (i32, i32) {
    %c0_i32 = arith.constant 0 : i32
    %c0_i32_0 = arith.constant 0 : i32
    %c0_i32_1 = arith.constant 0 : i32
    return %c0_i32, %c0_i32_0 : i32, i32
  }
}

module attributes {stable_mosaic.version = 11 : i64} {
  func.func @_matmul_stats_kernel(%arg0: i32, %arg1: memref<128x72xbf16, #tpu.memory_space<vmem>>, %arg2: memref<72x8xbf16, #tpu.memory_space<vmem>>, %arg3: memref<128x8xf32, #tpu.memory_space<vmem>>, %arg4: memref<2x8xf32, #tpu.memory_space<vmem>>) attributes {dimension_semantics = [#tpu.dimension_semantics<arbitrary>], iteration_bounds = array<i64: 1>, scalar_prefetch = 0 : i64, scratch_operands = 0 : i64, tpu.core_type = #tpu.core_type<tc>, window_params = [{transform_indices = @transform_0, window_bounds = array<i64: 128, 72>}, {pipeline_mode = #tpu.pipeline_mode<synchronous>, transform_indices = @transform_1, window_bounds = array<i64: 72, 8>}, {transform_indices = @transform_2, window_bounds = array<i64: 128, 8>}, {pipeline_mode = #tpu.pipeline_mode<synchronous>, transform_indices = @transform_3, window_bounds = array<i64: 2, 8>}]} {
    %c0_i32 = arith.constant 0 : i32
    %0 = arith.cmpi eq, %arg0, %c0_i32 : i32
    %1 = arith.extui %0 : i1 to i32
    %c0_i32_0 = arith.constant 0 : i32
    %2 = arith.cmpi ne, %1, %c0_i32_0 : i32
    scf.if %2 {
      %cst_15 = arith.constant 0.000000e+00 : f32
      %18 = vector.broadcast %cst_15 : f32 to vector<2x8xf32>
      %c0_16 = arith.constant 0 : index
      %c0_17 = arith.constant 0 : index
      %19 = vector.load %arg4[%c0_16, %c0_17] : memref<2x8xf32, #tpu.memory_space<vmem>>, vector<2x8xf32>
      tpu.vector_store %arg4[%c0_16, %c0_17], %18 {strides = array<i32>} : memref<2x8xf32, #tpu.memory_space<vmem>>, vector<2x8xf32>,
    } else {
    }
    %c0 = arith.constant 0 : index
    %c0_1 = arith.constant 0 : index
    %3 = vector.load %arg1[%c0, %c0_1] : memref<128x72xbf16, #tpu.memory_space<vmem>>, vector<128x72xbf16>
    %c0_2 = arith.constant 0 : index
    %c0_3 = arith.constant 0 : index
    %4 = vector.load %arg2[%c0_2, %c0_3] : memref<72x8xbf16, #tpu.memory_space<vmem>>, vector<72x8xbf16>
    %cst = arith.constant dense<0.000000e+00> : vector<128x8xf32>
    %5 = tpu.matmul %3, %4, %cst {dimension_numbers = #tpu.dot_dimension_numbers<[1], [0], [0], [1], [0, 0, 1, 1], [], []>} : vector<128x72xbf16>, vector<72x8xbf16>, vector<128x8xf32> -> vector<128x8xf32>
    %c0_4 = arith.constant 0 : index
    %c0_5 = arith.constant 0 : index
    %6 = vector.load %arg3[%c0_4, %c0_5] : memref<128x8xf32, #tpu.memory_space<vmem>>, vector<128x8xf32>
    tpu.vector_store %arg3[%c0_4, %c0_5], %5 {strides = array<i32>} : memref<128x8xf32, #tpu.memory_space<vmem>>, vector<128x8xf32>,
    %c0_6 = arith.constant 0 : index
    %c0_7 = arith.constant 0 : index
    %7 = vector.load %arg4[%c0_6, %c0_7] : memref<2x8xf32, #tpu.memory_space<vmem>>, vector<1x8xf32>
    %cst_8 = arith.constant dense<0.000000e+00> : vector<8xf32>
    %8 = vector.multi_reduction <add>, %5, %cst_8 [0] : vector<128x8xf32> to vector<8xf32>
    %9 = vector.shape_cast %8 : vector<8xf32> to vector<1x8xf32>
    %10 = arith.addf %7, %9 : vector<1x8xf32>
    %c0_9 = arith.constant 0 : index
    %c0_10 = arith.constant 0 : index
    %11 = vector.load %arg4[%c0_9, %c0_10] : memref<2x8xf32, #tpu.memory_space<vmem>>, vector<1x8xf32>
    tpu.vector_store %arg4[%c0_9, %c0_10], %10 {strides = array<i32>} : memref<2x8xf32, #tpu.memory_space<vmem>>, vector<1x8xf32>,
    %c1 = arith.constant 1 : index
    %c0_11 = arith.constant 0 : index
    %12 = vector.load %arg4[%c1, %c0_11] : memref<2x8xf32, #tpu.memory_space<vmem>>, vector<1x8xf32>
    %13 = arith.mulf %5, %5 : vector<128x8xf32>
    %cst_12 = arith.constant dense<0.000000e+00> : vector<8xf32>
    %14 = vector.multi_reduction <add>, %13, %cst_12 [0] : vector<128x8xf32> to vector<8xf32>
    %15 = vector.shape_cast %14 : vector<8xf32> to vector<1x8xf32>
    %16 = arith.addf %12, %15 : vector<1x8xf32>
    %c1_13 = arith.constant 1 : index
    %c0_14 = arith.constant 0 : index
    %17 = vector.load %arg4[%c1_13, %c0_14] : memref<2x8xf32, #tpu.memory_space<vmem>>, vector<1x8xf32>
    tpu.vector_store %arg4[%c1_13, %c0_14], %16 {strides = array<i32>} : memref<2x8xf32, #tpu.memory_space<vmem>>, vector<1x8xf32>,
    return
  }
  func.func @transform_0(%arg0: i32) -> (i32, i32) {
    %c0_i32 = arith.constant 0 : i32
    %c0_i32_0 = arith.constant 0 : i32
    return %arg0, %c0_i32 : i32, i32
  }
  func.func @transform_1(%arg0: i32) -> (i32, i32) {
    %c0_i32 = arith.constant 0 : i32
    %c0_i32_0 = arith.constant 0 : i32
    %c0_i32_1 = arith.constant 0 : i32
    return %c0_i32, %c0_i32_0 : i32, i32
  }
  func.func @transform_2(%arg0: i32) -> (i32, i32) {
    %c0_i32 = arith.constant 0 : i32
    %c0_i32_0 = arith.constant 0 : i32
    return %arg0, %c0_i32 : i32, i32
  }
  func.func @transform_3(%arg0: i32) -> (i32, i32) {
    %c0_i32 = arith.constant 0 : i32
    %c0_i32_0 = arith.constant 0 : i32
    %c0_i32_1 = arith.constant 0 : i32
    return %c0_i32, %c0_i32_0 : i32, i32
  }
}

module attributes {stable_mosaic.version = 11 : i64} {
  func.func @kernel(%arg0: i32, %arg1: memref<128x8xf32, #tpu.memory_space<vmem>>, %arg2: memref<2x8xf32, #tpu.memory_space<vmem>>, %arg3: memref<1x8xf32, #tpu.memory_space<vmem>>, %arg4: memref<1x8xf32, #tpu.memory_space<vmem>>, %arg5: memref<128x8xbf16, #tpu.memory_space<vmem>>) attributes {dimension_semantics = [#tpu.dimension_semantics<parallel>], iteration_bounds = array<i64: 1>, scalar_prefetch = 0 : i64, scratch_operands = 0 : i64, tpu.core_type = #tpu.core_type<tc>, window_params = [{transform_indices = @transform_0, window_bounds = array<i64: 128, 8>}, {pipeline_mode = #tpu.pipeline_mode<synchronous>, transform_indices = @transform_1, window_bounds = array<i64: 2, 8>}, {pipeline_mode = #tpu.pipeline_mode<synchronous>, transform_indices = @transform_2, window_bounds = array<i64: 1, 8>}, {pipeline_mode = #tpu.pipeline_mode<synchronous>, transform_indices = @transform_3, window_bounds = array<i64: 1, 8>}, {transform_indices = @transform_4, window_bounds = array<i64: 128, 8>}]} {
    %c0 = arith.constant 0 : index
    %c0_0 = arith.constant 0 : index
    %0 = vector.load %arg1[%c0, %c0_0] : memref<128x8xf32, #tpu.memory_space<vmem>>, vector<128x8xf32>
    %c0_1 = arith.constant 0 : index
    %c0_2 = arith.constant 0 : index
    %1 = vector.load %arg2[%c0_1, %c0_2] : memref<2x8xf32, #tpu.memory_space<vmem>>, vector<1x8xf32>
    %cst = arith.constant 7.812500e-03 : f32
    %2 = vector.broadcast %cst : f32 to vector<1x8xf32>
    %3 = arith.mulf %1, %2 : vector<1x8xf32>
    %c1 = arith.constant 1 : index
    %c0_3 = arith.constant 0 : index
    %4 = vector.load %arg2[%c1, %c0_3] : memref<2x8xf32, #tpu.memory_space<vmem>>, vector<1x8xf32>
    %cst_4 = arith.constant 7.812500e-03 : f32
    %5 = vector.broadcast %cst_4 : f32 to vector<1x8xf32>
    %6 = arith.mulf %4, %5 : vector<1x8xf32>
    %7 = arith.mulf %3, %3 : vector<1x8xf32>
    %8 = arith.subf %6, %7 : vector<1x8xf32>
    %cst_5 = arith.constant 0.000000e+00 : f32
    %9 = vector.broadcast %cst_5 : f32 to vector<1x8xf32>
    %10 = arith.maximumf %8, %9 : vector<1x8xf32>
    %cst_6 = arith.constant 9.99999974E-6 : f32
    %11 = vector.broadcast %cst_6 : f32 to vector<1x8xf32>
    %12 = arith.addf %10, %11 : vector<1x8xf32>
    %13 = math.rsqrt %12 : vector<1x8xf32>
    %c0_7 = arith.constant 0 : index
    %c0_8 = arith.constant 0 : index
    %14 = vector.load %arg3[%c0_7, %c0_8] : memref<1x8xf32, #tpu.memory_space<vmem>>, vector<1x8xf32>
    %15 = arith.mulf %13, %14 : vector<1x8xf32>
    %c0_9 = arith.constant 0 : index
    %c0_10 = arith.constant 0 : index
    %16 = vector.load %arg4[%c0_9, %c0_10] : memref<1x8xf32, #tpu.memory_space<vmem>>, vector<1x8xf32>
    %17 = arith.mulf %3, %15 : vector<1x8xf32>
    %18 = arith.subf %16, %17 : vector<1x8xf32>
    %19 = vector.broadcast %15 : vector<1x8xf32> to vector<128x8xf32>
    %20 = arith.mulf %0, %19 : vector<128x8xf32>
    %21 = vector.broadcast %18 : vector<1x8xf32> to vector<128x8xf32>
    %22 = arith.addf %20, %21 : vector<128x8xf32>
    %cst_11 = arith.constant 0.000000e+00 : f32
    %23 = vector.broadcast %cst_11 : f32 to vector<128x8xf32>
    %24 = arith.maximumf %22, %23 : vector<128x8xf32>
    %25 = arith.truncf %24 : vector<128x8xf32> to vector<128x8xbf16>
    %c0_12 = arith.constant 0 : index
    %c0_13 = arith.constant 0 : index
    %26 = vector.load %arg5[%c0_12, %c0_13] : memref<128x8xbf16, #tpu.memory_space<vmem>>, vector<128x8xbf16>
    tpu.vector_store %arg5[%c0_12, %c0_13], %25 {strides = array<i32>} : memref<128x8xbf16, #tpu.memory_space<vmem>>, vector<128x8xbf16>,
    return
  }
  func.func @transform_0(%arg0: i32) -> (i32, i32) {
    %c0_i32 = arith.constant 0 : i32
    %c0_i32_0 = arith.constant 0 : i32
    return %arg0, %c0_i32 : i32, i32
  }
  func.func @transform_1(%arg0: i32) -> (i32, i32) {
    %c0_i32 = arith.constant 0 : i32
    %c0_i32_0 = arith.constant 0 : i32
    %c0_i32_1 = arith.constant 0 : i32
    return %c0_i32, %c0_i32_0 : i32, i32
  }
  func.func @transform_2(%arg0: i32) -> (i32, i32) {
    %c0_i32 = arith.constant 0 : i32
    %c0_i32_0 = arith.constant 0 : i32
    %c0_i32_1 = arith.constant 0 : i32
    return %c0_i32, %c0_i32_0 : i32, i32
  }
  func.func @transform_3(%arg0: i32) -> (i32, i32) {
    %c0_i32 = arith.constant 0 : i32
    %c0_i32_0 = arith.constant 0 : i32
    %c0_i32_1 = arith.constant 0 : i32
    return %c0_i32, %c0_i32_0 : i32, i32
  }
  func.func @transform_4(%arg0: i32) -> (i32, i32) {
    %c0_i32 = arith.constant 0 : i32
    %c0_i32_0 = arith.constant 0 : i32
    return %arg0, %c0_i32 : i32, i32
  }
}

module attributes {stable_mosaic.version = 11 : i64} {
  func.func @_dual_matmul_stats_kernel(%arg0: i32, %arg1: memref<128x8xbf16, #tpu.memory_space<vmem>>, %arg2: memref<8x32xbf16, #tpu.memory_space<vmem>>, %arg3: memref<128x16xbf16, #tpu.memory_space<vmem>>, %arg4: memref<16x32xbf16, #tpu.memory_space<vmem>>, %arg5: memref<128x32xf32, #tpu.memory_space<vmem>>, %arg6: memref<128x32xf32, #tpu.memory_space<vmem>>, %arg7: memref<2x32xf32, #tpu.memory_space<vmem>>, %arg8: memref<2x32xf32, #tpu.memory_space<vmem>>) attributes {dimension_semantics = [#tpu.dimension_semantics<arbitrary>], iteration_bounds = array<i64: 1>, scalar_prefetch = 0 : i64, scratch_operands = 0 : i64, tpu.core_type = #tpu.core_type<tc>, window_params = [{transform_indices = @transform_0, window_bounds = array<i64: 128, 8>}, {pipeline_mode = #tpu.pipeline_mode<synchronous>, transform_indices = @transform_1, window_bounds = array<i64: 8, 32>}, {transform_indices = @transform_2, window_bounds = array<i64: 128, 16>}, {pipeline_mode = #tpu.pipeline_mode<synchronous>, transform_indices = @transform_3, window_bounds = array<i64: 16, 32>}, {transform_indices = @transform_4, window_bounds = array<i64: 128, 32>}, {transform_indices = @transform_5, window_bounds = array<i64: 128, 32>}, {pipeline_mode = #tpu.pipeline_mode<synchronous>, transform_indices = @transform_6, window_bounds = array<i64: 2, 32>}, {pipeline_mode = #tpu.pipeline_mode<synchronous>, transform_indices = @transform_7, window_bounds = array<i64: 2, 32>}]} {
    %c0_i32 = arith.constant 0 : i32
    %0 = arith.cmpi eq, %arg0, %c0_i32 : i32
    %1 = arith.extui %0 : i1 to i32
    %c0_i32_0 = arith.constant 0 : i32
    %2 = arith.cmpi ne, %1, %c0_i32_0 : i32
    scf.if %2 {
      %cst_32 = arith.constant 0.000000e+00 : f32
      %33 = vector.broadcast %cst_32 : f32 to vector<2x32xf32>
      %c0_33 = arith.constant 0 : index
      %c0_34 = arith.constant 0 : index
      %34 = vector.load %arg7[%c0_33, %c0_34] : memref<2x32xf32, #tpu.memory_space<vmem>>, vector<2x32xf32>
      tpu.vector_store %arg7[%c0_33, %c0_34], %33 {strides = array<i32>} : memref<2x32xf32, #tpu.memory_space<vmem>>, vector<2x32xf32>,
      %cst_35 = arith.constant 0.000000e+00 : f32
      %35 = vector.broadcast %cst_35 : f32 to vector<2x32xf32>
      %c0_36 = arith.constant 0 : index
      %c0_37 = arith.constant 0 : index
      %36 = vector.load %arg8[%c0_36, %c0_37] : memref<2x32xf32, #tpu.memory_space<vmem>>, vector<2x32xf32>
      tpu.vector_store %arg8[%c0_36, %c0_37], %35 {strides = array<i32>} : memref<2x32xf32, #tpu.memory_space<vmem>>, vector<2x32xf32>,
    } else {
    }
    %c0 = arith.constant 0 : index
    %c0_1 = arith.constant 0 : index
    %3 = vector.load %arg1[%c0, %c0_1] : memref<128x8xbf16, #tpu.memory_space<vmem>>, vector<128x8xbf16>
    %c0_2 = arith.constant 0 : index
    %c0_3 = arith.constant 0 : index
    %4 = vector.load %arg2[%c0_2, %c0_3] : memref<8x32xbf16, #tpu.memory_space<vmem>>, vector<8x32xbf16>
    %cst = arith.constant dense<0.000000e+00> : vector<128x32xf32>
    %5 = tpu.matmul %3, %4, %cst {dimension_numbers = #tpu.dot_dimension_numbers<[1], [0], [0], [1], [0, 0, 1, 1], [], []>} : vector<128x8xbf16>, vector<8x32xbf16>, vector<128x32xf32> -> vector<128x32xf32>
    %c0_4 = arith.constant 0 : index
    %c0_5 = arith.constant 0 : index
    %6 = vector.load %arg3[%c0_4, %c0_5] : memref<128x16xbf16, #tpu.memory_space<vmem>>, vector<128x16xbf16>
    %c0_6 = arith.constant 0 : index
    %c0_7 = arith.constant 0 : index
    %7 = vector.load %arg4[%c0_6, %c0_7] : memref<16x32xbf16, #tpu.memory_space<vmem>>, vector<16x32xbf16>
    %cst_8 = arith.constant dense<0.000000e+00> : vector<128x32xf32>
    %8 = tpu.matmul %6, %7, %cst_8 {dimension_numbers = #tpu.dot_dimension_numbers<[1], [0], [0], [1], [0, 0, 1, 1], [], []>} : vector<128x16xbf16>, vector<16x32xbf16>, vector<128x32xf32> -> vector<128x32xf32>
    %c0_9 = arith.constant 0 : index
    %c0_10 = arith.constant 0 : index
    %9 = vector.load %arg5[%c0_9, %c0_10] : memref<128x32xf32, #tpu.memory_space<vmem>>, vector<128x32xf32>
    tpu.vector_store %arg5[%c0_9, %c0_10], %5 {strides = array<i32>} : memref<128x32xf32, #tpu.memory_space<vmem>>, vector<128x32xf32>,
    %c0_11 = arith.constant 0 : index
    %c0_12 = arith.constant 0 : index
    %10 = vector.load %arg6[%c0_11, %c0_12] : memref<128x32xf32, #tpu.memory_space<vmem>>, vector<128x32xf32>
    tpu.vector_store %arg6[%c0_11, %c0_12], %8 {strides = array<i32>} : memref<128x32xf32, #tpu.memory_space<vmem>>, vector<128x32xf32>,
    %c0_13 = arith.constant 0 : index
    %c0_14 = arith.constant 0 : index
    %11 = vector.load %arg7[%c0_13, %c0_14] : memref<2x32xf32, #tpu.memory_space<vmem>>, vector<1x32xf32>
    %cst_15 = arith.constant dense<0.000000e+00> : vector<32xf32>
    %12 = vector.multi_reduction <add>, %5, %cst_15 [0] : vector<128x32xf32> to vector<32xf32>
    %13 = vector.shape_cast %12 : vector<32xf32> to vector<1x32xf32>
    %14 = arith.addf %11, %13 : vector<1x32xf32>
    %c0_16 = arith.constant 0 : index
    %c0_17 = arith.constant 0 : index
    %15 = vector.load %arg7[%c0_16, %c0_17] : memref<2x32xf32, #tpu.memory_space<vmem>>, vector<1x32xf32>
    tpu.vector_store %arg7[%c0_16, %c0_17], %14 {strides = array<i32>} : memref<2x32xf32, #tpu.memory_space<vmem>>, vector<1x32xf32>,
    %c1 = arith.constant 1 : index
    %c0_18 = arith.constant 0 : index
    %16 = vector.load %arg7[%c1, %c0_18] : memref<2x32xf32, #tpu.memory_space<vmem>>, vector<1x32xf32>
    %17 = arith.mulf %5, %5 : vector<128x32xf32>
    %cst_19 = arith.constant dense<0.000000e+00> : vector<32xf32>
    %18 = vector.multi_reduction <add>, %17, %cst_19 [0] : vector<128x32xf32> to vector<32xf32>
    %19 = vector.shape_cast %18 : vector<32xf32> to vector<1x32xf32>
    %20 = arith.addf %16, %19 : vector<1x32xf32>
    %c1_20 = arith.constant 1 : index
    %c0_21 = arith.constant 0 : index
    %21 = vector.load %arg7[%c1_20, %c0_21] : memref<2x32xf32, #tpu.memory_space<vmem>>, vector<1x32xf32>
    tpu.vector_store %arg7[%c1_20, %c0_21], %20 {strides = array<i32>} : memref<2x32xf32, #tpu.memory_space<vmem>>, vector<1x32xf32>,
    %c0_22 = arith.constant 0 : index
    %c0_23 = arith.constant 0 : index
    %22 = vector.load %arg8[%c0_22, %c0_23] : memref<2x32xf32, #tpu.memory_space<vmem>>, vector<1x32xf32>
    %cst_24 = arith.constant dense<0.000000e+00> : vector<32xf32>
    %23 = vector.multi_reduction <add>, %8, %cst_24 [0] : vector<128x32xf32> to vector<32xf32>
    %24 = vector.shape_cast %23 : vector<32xf32> to vector<1x32xf32>
    %25 = arith.addf %22, %24 : vector<1x32xf32>
    %c0_25 = arith.constant 0 : index
    %c0_26 = arith.constant 0 : index
    %26 = vector.load %arg8[%c0_25, %c0_26] : memref<2x32xf32, #tpu.memory_space<vmem>>, vector<1x32xf32>
    tpu.vector_store %arg8[%c0_25, %c0_26], %25 {strides = array<i32>} : memref<2x32xf32, #tpu.memory_space<vmem>>, vector<1x32xf32>,
    %c1_27 = arith.constant 1 : index
    %c0_28 = arith.constant 0 : index
    %27 = vector.load %arg8[%c1_27, %c0_28] : memref<2x32xf32, #tpu.memory_space<vmem>>, vector<1x32xf32>
    %28 = arith.mulf %8, %8 : vector<128x32xf32>
    %cst_29 = arith.constant dense<0.000000e+00> : vector<32xf32>
    %29 = vector.multi_reduction <add>, %28, %cst_29 [0] : vector<128x32xf32> to vector<32xf32>
    %30 = vector.shape_cast %29 : vector<32xf32> to vector<1x32xf32>
    %31 = arith.addf %27, %30 : vector<1x32xf32>
    %c1_30 = arith.constant 1 : index
    %c0_31 = arith.constant 0 : index
    %32 = vector.load %arg8[%c1_30, %c0_31] : memref<2x32xf32, #tpu.memory_space<vmem>>, vector<1x32xf32>
    tpu.vector_store %arg8[%c1_30, %c0_31], %31 {strides = array<i32>} : memref<2x32xf32, #tpu.memory_space<vmem>>, vector<1x32xf32>,
    return
  }
  func.func @transform_0(%arg0: i32) -> (i32, i32) {
    %c0_i32 = arith.constant 0 : i32
    %c0_i32_0 = arith.constant 0 : i32
    return %arg0, %c0_i32 : i32, i32
  }
  func.func @transform_1(%arg0: i32) -> (i32, i32) {
    %c0_i32 = arith.constant 0 : i32
    %c0_i32_0 = arith.constant 0 : i32
    %c0_i32_1 = arith.constant 0 : i32
    return %c0_i32, %c0_i32_0 : i32, i32
  }
  func.func @transform_2(%arg0: i32) -> (i32, i32) {
    %c0_i32 = arith.constant 0 : i32
    %c0_i32_0 = arith.constant 0 : i32
    return %arg0, %c0_i32 : i32, i32
  }
  func.func @transform_3(%arg0: i32) -> (i32, i32) {
    %c0_i32 = arith.constant 0 : i32
    %c0_i32_0 = arith.constant 0 : i32
    %c0_i32_1 = arith.constant 0 : i32
    return %c0_i32, %c0_i32_0 : i32, i32
  }
  func.func @transform_4(%arg0: i32) -> (i32, i32) {
    %c0_i32 = arith.constant 0 : i32
    %c0_i32_0 = arith.constant 0 : i32
    return %arg0, %c0_i32 : i32, i32
  }
  func.func @transform_5(%arg0: i32) -> (i32, i32) {
    %c0_i32 = arith.constant 0 : i32
    %c0_i32_0 = arith.constant 0 : i32
    return %arg0, %c0_i32 : i32, i32
  }
  func.func @transform_6(%arg0: i32) -> (i32, i32) {
    %c0_i32 = arith.constant 0 : i32
    %c0_i32_0 = arith.constant 0 : i32
    %c0_i32_1 = arith.constant 0 : i32
    return %c0_i32, %c0_i32_0 : i32, i32
  }
  func.func @transform_7(%arg0: i32) -> (i32, i32) {
    %c0_i32 = arith.constant 0 : i32
    %c0_i32_0 = arith.constant 0 : i32
    %c0_i32_1 = arith.constant 0 : i32
    return %c0_i32, %c0_i32_0 : i32, i32
  }
}

module attributes {stable_mosaic.version = 11 : i64} {
  func.func @kernel(%arg0: i32, %arg1: memref<128x32xf32, #tpu.memory_space<vmem>>, %arg2: memref<2x32xf32, #tpu.memory_space<vmem>>, %arg3: memref<1x32xf32, #tpu.memory_space<vmem>>, %arg4: memref<1x32xf32, #tpu.memory_space<vmem>>, %arg5: memref<128x32xf32, #tpu.memory_space<vmem>>, %arg6: memref<2x32xf32, #tpu.memory_space<vmem>>, %arg7: memref<1x32xf32, #tpu.memory_space<vmem>>, %arg8: memref<1x32xf32, #tpu.memory_space<vmem>>, %arg9: memref<128x32xf32, #tpu.memory_space<vmem>>) attributes {dimension_semantics = [#tpu.dimension_semantics<parallel>], iteration_bounds = array<i64: 1>, scalar_prefetch = 0 : i64, scratch_operands = 0 : i64, tpu.core_type = #tpu.core_type<tc>, window_params = [{transform_indices = @transform_0, window_bounds = array<i64: 128, 32>}, {pipeline_mode = #tpu.pipeline_mode<synchronous>, transform_indices = @transform_1, window_bounds = array<i64: 2, 32>}, {pipeline_mode = #tpu.pipeline_mode<synchronous>, transform_indices = @transform_2, window_bounds = array<i64: 1, 32>}, {pipeline_mode = #tpu.pipeline_mode<synchronous>, transform_indices = @transform_3, window_bounds = array<i64: 1, 32>}, {transform_indices = @transform_4, window_bounds = array<i64: 128, 32>}, {pipeline_mode = #tpu.pipeline_mode<synchronous>, transform_indices = @transform_5, window_bounds = array<i64: 2, 32>}, {pipeline_mode = #tpu.pipeline_mode<synchronous>, transform_indices = @transform_6, window_bounds = array<i64: 1, 32>}, {pipeline_mode = #tpu.pipeline_mode<synchronous>, transform_indices = @transform_7, window_bounds = array<i64: 1, 32>}, {transform_indices = @transform_8, window_bounds = array<i64: 128, 32>}]} {
    %c0 = arith.constant 0 : index
    %c0_0 = arith.constant 0 : index
    %0 = vector.load %arg5[%c0, %c0_0] : memref<128x32xf32, #tpu.memory_space<vmem>>, vector<128x32xf32>
    %c0_1 = arith.constant 0 : index
    %c0_2 = arith.constant 0 : index
    %1 = vector.load %arg6[%c0_1, %c0_2] : memref<2x32xf32, #tpu.memory_space<vmem>>, vector<1x32xf32>
    %cst = arith.constant 7.812500e-03 : f32
    %2 = vector.broadcast %cst : f32 to vector<1x32xf32>
    %3 = arith.mulf %1, %2 : vector<1x32xf32>
    %c1 = arith.constant 1 : index
    %c0_3 = arith.constant 0 : index
    %4 = vector.load %arg6[%c1, %c0_3] : memref<2x32xf32, #tpu.memory_space<vmem>>, vector<1x32xf32>
    %cst_4 = arith.constant 7.812500e-03 : f32
    %5 = vector.broadcast %cst_4 : f32 to vector<1x32xf32>
    %6 = arith.mulf %4, %5 : vector<1x32xf32>
    %7 = arith.mulf %3, %3 : vector<1x32xf32>
    %8 = arith.subf %6, %7 : vector<1x32xf32>
    %cst_5 = arith.constant 0.000000e+00 : f32
    %9 = vector.broadcast %cst_5 : f32 to vector<1x32xf32>
    %10 = arith.maximumf %8, %9 : vector<1x32xf32>
    %cst_6 = arith.constant 9.99999974E-6 : f32
    %11 = vector.broadcast %cst_6 : f32 to vector<1x32xf32>
    %12 = arith.addf %10, %11 : vector<1x32xf32>
    %13 = math.rsqrt %12 : vector<1x32xf32>
    %c0_7 = arith.constant 0 : index
    %c0_8 = arith.constant 0 : index
    %14 = vector.load %arg7[%c0_7, %c0_8] : memref<1x32xf32, #tpu.memory_space<vmem>>, vector<1x32xf32>
    %15 = arith.mulf %13, %14 : vector<1x32xf32>
    %c0_9 = arith.constant 0 : index
    %c0_10 = arith.constant 0 : index
    %16 = vector.load %arg8[%c0_9, %c0_10] : memref<1x32xf32, #tpu.memory_space<vmem>>, vector<1x32xf32>
    %17 = arith.mulf %3, %15 : vector<1x32xf32>
    %18 = arith.subf %16, %17 : vector<1x32xf32>
    %19 = vector.broadcast %15 : vector<1x32xf32> to vector<128x32xf32>
    %20 = arith.mulf %0, %19 : vector<128x32xf32>
    %21 = vector.broadcast %18 : vector<1x32xf32> to vector<128x32xf32>
    %22 = arith.addf %20, %21 : vector<128x32xf32>
    %c0_11 = arith.constant 0 : index
    %c0_12 = arith.constant 0 : index
    %23 = vector.load %arg1[%c0_11, %c0_12] : memref<128x32xf32, #tpu.memory_space<vmem>>, vector<128x32xf32>
    %c0_13 = arith.constant 0 : index
    %c0_14 = arith.constant 0 : index
    %24 = vector.load %arg2[%c0_13, %c0_14] : memref<2x32xf32, #tpu.memory_space<vmem>>, vector<1x32xf32>
    %cst_15 = arith.constant 7.812500e-03 : f32
    %25 = vector.broadcast %cst_15 : f32 to vector<1x32xf32>
    %26 = arith.mulf %24, %25 : vector<1x32xf32>
    %c1_16 = arith.constant 1 : index
    %c0_17 = arith.constant 0 : index
    %27 = vector.load %arg2[%c1_16, %c0_17] : memref<2x32xf32, #tpu.memory_space<vmem>>, vector<1x32xf32>
    %cst_18 = arith.constant 7.812500e-03 : f32
    %28 = vector.broadcast %cst_18 : f32 to vector<1x32xf32>
    %29 = arith.mulf %27, %28 : vector<1x32xf32>
    %30 = arith.mulf %26, %26 : vector<1x32xf32>
    %31 = arith.subf %29, %30 : vector<1x32xf32>
    %cst_19 = arith.constant 0.000000e+00 : f32
    %32 = vector.broadcast %cst_19 : f32 to vector<1x32xf32>
    %33 = arith.maximumf %31, %32 : vector<1x32xf32>
    %cst_20 = arith.constant 9.99999974E-6 : f32
    %34 = vector.broadcast %cst_20 : f32 to vector<1x32xf32>
    %35 = arith.addf %33, %34 : vector<1x32xf32>
    %36 = math.rsqrt %35 : vector<1x32xf32>
    %c0_21 = arith.constant 0 : index
    %c0_22 = arith.constant 0 : index
    %37 = vector.load %arg3[%c0_21, %c0_22] : memref<1x32xf32, #tpu.memory_space<vmem>>, vector<1x32xf32>
    %38 = arith.mulf %36, %37 : vector<1x32xf32>
    %c0_23 = arith.constant 0 : index
    %c0_24 = arith.constant 0 : index
    %39 = vector.load %arg4[%c0_23, %c0_24] : memref<1x32xf32, #tpu.memory_space<vmem>>, vector<1x32xf32>
    %40 = arith.mulf %26, %38 : vector<1x32xf32>
    %41 = arith.subf %39, %40 : vector<1x32xf32>
    %42 = vector.broadcast %38 : vector<1x32xf32> to vector<128x32xf32>
    %43 = arith.mulf %23, %42 : vector<128x32xf32>
    %44 = vector.broadcast %41 : vector<1x32xf32> to vector<128x32xf32>
    %45 = arith.addf %43, %44 : vector<128x32xf32>
    %46 = arith.addf %45, %22 : vector<128x32xf32>
    %cst_25 = arith.constant 0.000000e+00 : f32
    %47 = vector.broadcast %cst_25 : f32 to vector<128x32xf32>
    %48 = arith.maximumf %46, %47 : vector<128x32xf32>
    %c0_26 = arith.constant 0 : index
    %c0_27 = arith.constant 0 : index
    %49 = vector.load %arg9[%c0_26, %c0_27] : memref<128x32xf32, #tpu.memory_space<vmem>>, vector<128x32xf32>
    tpu.vector_store %arg9[%c0_26, %c0_27], %48 {strides = array<i32>} : memref<128x32xf32, #tpu.memory_space<vmem>>, vector<128x32xf32>,
    return
  }
  func.func @transform_0(%arg0: i32) -> (i32, i32) {
    %c0_i32 = arith.constant 0 : i32
    %c0_i32_0 = arith.constant 0 : i32
    return %arg0, %c0_i32 : i32, i32
  }
  func.func @transform_1(%arg0: i32) -> (i32, i32) {
    %c0_i32 = arith.constant 0 : i32
    %c0_i32_0 = arith.constant 0 : i32
    %c0_i32_1 = arith.constant 0 : i32
    return %c0_i32, %c0_i32_0 : i32, i32
  }
  func.func @transform_2(%arg0: i32) -> (i32, i32) {
    %c0_i32 = arith.constant 0 : i32
    %c0_i32_0 = arith.constant 0 : i32
    %c0_i32_1 = arith.constant 0 : i32
    return %c0_i32, %c0_i32_0 : i32, i32
  }
  func.func @transform_3(%arg0: i32) -> (i32, i32) {
    %c0_i32 = arith.constant 0 : i32
    %c0_i32_0 = arith.constant 0 : i32
    %c0_i32_1 = arith.constant 0 : i32
    return %c0_i32, %c0_i32_0 : i32, i32
  }
  func.func @transform_4(%arg0: i32) -> (i32, i32) {
    %c0_i32 = arith.constant 0 : i32
    %c0_i32_0 = arith.constant 0 : i32
    return %arg0, %c0_i32 : i32, i32
  }
  func.func @transform_5(%arg0: i32) -> (i32, i32) {
    %c0_i32 = arith.constant 0 : i32
    %c0_i32_0 = arith.constant 0 : i32
    %c0_i32_1 = arith.constant 0 : i32
    return %c0_i32, %c0_i32_0 : i32, i32
  }
  func.func @transform_6(%arg0: i32) -> (i32, i32) {
    %c0_i32 = arith.constant 0 : i32
    %c0_i32_0 = arith.constant 0 : i32
    %c0_i32_1 = arith.constant 0 : i32
    return %c0_i32, %c0_i32_0 : i32, i32
  }
  func.func @transform_7(%arg0: i32) -> (i32, i32) {
    %c0_i32 = arith.constant 0 : i32
    %c0_i32_0 = arith.constant 0 : i32
    %c0_i32_1 = arith.constant 0 : i32
    return %c0_i32, %c0_i32_0 : i32, i32
  }
  func.func @transform_8(%arg0: i32) -> (i32, i32) {
    %c0_i32 = arith.constant 0 : i32
    %c0_i32_0 = arith.constant 0 : i32
    return %arg0, %c0_i32 : i32, i32
  }
}

</mosaic_0001>

<bundles_post_ra>
// kernel: bottleneck_forward.7
= control target key start
LH: loop header
LB: loop body
LE: loop exit
PB: predicated region body
PF: predicated region fallthrough
CT: control target
= control target key end

     0   :  { %s688_s15 = smov 0   ;;  %s889_s0 = inlined_call_operand.vmem [shape: f32[512,8], index: 0, kind: input, shape index: {}]   ;;  %s890_s1 = inlined_call_operand.vmem [shape: f32[2,8], index: 1, kind: input, shape index: {}]   ;;  %s891_s2 = inlined_call_operand.vmem [shape: f32[1,8], index: 2, kind: input, shape index: {}]   ;;  %s892_s3 = inlined_call_operand.vmem [shape: f32[1,8], index: 3, kind: input, shape index: {}]   ;;  %s893_s4 = inlined_call_operand.vmem [shape: bf16[512,8], index: 4, kind: output, shape index: {}]  }
   0x1 LB: > { %s570_s16 = sadd.s32 4294967295, %s661_s15   ;;  %p574_p0 = scmp.ge.s32.totalorder %s661_s15, 1  ;;  %s661_s15 = sphi %s688_s15, %s14_s15  }
   0x2   : > { %p163_p1 = scmp.lt.s32.totalorder %s661_s15, 3 }
   0x4   : > { %p164_p2 = pnand %p574_p0, %p163_p1 }
   0x5   : > { %v233_v0 = vld [vmem:[%s890_s1] sm:$0x1] (!%p164_p2)  ;;  %v235_v1 = vld [vmem:[%s890_s1 + $0x1] sm:$0x1] (!%p164_p2)  ;;  %s575_s21 = sshll.u32 (!%p164_p2), %s570_s16, 5  ;;  %v247_v8 = vlaneseq (!%p164_p2)  ;;  %vm481_vm0 = vcmask (!%p164_p2), 60416  }
   0x6   : > { %167 = sbr.rel (%p164_p2) target bundleno = 70 (0x46), region = 36  ;;  %v234_v2 = vmul.f32 (!%p164_p2), 0.001953125, %v233_v0  ;;  %v236_v3 = vmul.f32 (!%p164_p2), 0.001953125, %v235_v1  ;;  %p190_p3 = scmp.lt.s32.totalorder (!%p164_p2), %s575_s21, 63  ;;  %v242_v10 = vld [vmem:[%s891_s2] sm:$0x1] (!%p164_p2) }
   0x7   : > { %v248_v9 = vshrl.u32 (!%p164_p2), %v247_v8, 7  ;;  %v244_v15 = vld [vmem:[%s892_s3] sm:$0x1] (!%p164_p2) }
   0x8   : > { %v237_v4 = vmul.f32 (!%p164_p2), %v234_v2, %v234_v2 }
   0x9   : > { %v249_v11 = vsub.s32 (!%p164_p2), 0, %v248_v9 }
   0xa   : > { %v238_v5 = vsub.f32 (!%p164_p2), %v236_v3, %v237_v4 }
   0xc   : > { %v239_v6 = vmax.f32 (!%p164_p2), %v238_v5, 0.0 }
   0xd   : > { %s895_s21 = smov (!%p190_p3, %s575_s21), 63 }
   0xe   : > { %v240_v7 = vadd.f32 1e-05, %v239_v6  ;;  %s576_s22 = sshll.u32 %s895_s21, 3  ;;  %s578_s30 = sshll.u32 %s895_s21, 2 }
   0xf   : > { %s708_s25 = scalar_lea.vmem %s889_s0, %s576_s22  ;;  %s760_s7 = scalar_lea.vmem %s893_s4, %s578_s30 }
  0x10   : > { %653 = vrsqrt.f32 %v240_v7  ;;  %v201_v13 = vld [vmem:[%s708_s25] sm:$0xff]  ;;  %v202_v16 = vld [vmem:[%s708_s25 + $0x8] sm:$0xff]  ;;  %v203_v17 = vld [vmem:[%s708_s25 + $0x10] sm:$0xff] }
  0x11   : > { %v204_v18 = vld [vmem:[%s708_s25 + $0x18] sm:$0xff]  ;;  %v205_v19 = vld [vmem:[%s708_s25 + $0x20] sm:$0xff]  ;;  %v206_v22 = vld [vmem:[%s708_s25 + $0x28] sm:$0xff] }
  0x12   : > { %v207_v23 = vld [vmem:[%s708_s25 + $0x30] sm:$0xff]  ;;  %v208_v24 = vld [vmem:[%s708_s25 + $0x38] sm:$0xff]  ;;  %v209_v25 = vld [vmem:[%s708_s25 + $0x40] sm:$0xff] }
  0x13   : > { %v210_v26 = vld [vmem:[%s708_s25 + $0x48] sm:$0xff]  ;;  %v211_v27 = vld [vmem:[%s708_s25 + $0x50] sm:$0xff]  ;;  %v212_v32 = vld [vmem:[%s708_s25 + $0x58] sm:$0xff] }
  0x14   : > { %v213_v33 = vld [vmem:[%s708_s25 + $0x60] sm:$0xff]  ;;  %v214_v34 = vld [vmem:[%s708_s25 + $0x68] sm:$0xff]  ;;  %v215_v3 = vld [vmem:[%s708_s25 + $0x70] sm:$0xff] }
  0x15   : > { %v216_v4 = vld [vmem:[%s708_s25 + $0x78] sm:$0xff] }
  0x1a   : > { %v654_v12 = vpop.eup %653 }
  0x1b   : > { %v243_v14 = vmul.f32 %v654_v12, %v242_v10 }
  0x1d   : > { %v245_v20 = vmul.f32 %v243_v14, %v234_v2  ;;  %v721_v21 = vrot.slane %v243_v14, %v249_v11 }
  0x1f   : > { %v246_v28 = vsub.f32 %v244_v15, %v245_v20  ;;  %v251_v29 = vmul.f32 %v721_v21, %v201_v13  ;;  %v252_v30 = vmul.f32 %v721_v21, %v202_v16  ;;  %v253_v31 = vmul.f32 %v721_v21, %v203_v17 }
  0x20   : > { %v254_v35 = vmul.f32 %v721_v21, %v204_v18  ;;  %v255_v36 = vmul.f32 %v721_v21, %v205_v19  ;;  %v256_v37 = vmul.f32 %v721_v21, %v206_v22  ;;  %v257_v38 = vmul.f32 %v721_v21, %v207_v23  ;;  %v217_v22 = vld [vmem:[%s708_s25 + $0x80] sm:$0xff] }
  0x21   : > { %v739_v39 = vrot.slane %v246_v28, %v249_v11  ;;  %v258_v40 = vmul.f32 %v721_v21, %v208_v24  ;;  %v259_v41 = vmul.f32 %v721_v21, %v209_v25  ;;  %v260_v42 = vmul.f32 %v721_v21, %v210_v26  ;;  %v219_v28 = vld [vmem:[%s708_s25 + $0x90] sm:$0xff] }
  0x22   : > { %v261_v43 = vmul.f32 %v721_v21, %v211_v27  ;;  %v262_v44 = vmul.f32 %v721_v21, %v212_v32  ;;  %v263_v45 = vmul.f32 %v721_v21, %v213_v33  ;;  %v264_v46 = vmul.f32 %v721_v21, %v214_v34  ;;  %v218_v27 = vld [vmem:[%s708_s25 + $0x88] sm:$0xff]  ;;  %v221_v34 = vld [vmem:[%s708_s25 + $0xa0] sm:$0xff] }
  0x23   : > { %v289_v47 = vadd.f32 %v739_v39, %v251_v29  ;;  %v290_v48 = vadd.f32 %v739_v39, %v252_v30  ;;  %v291_v49 = vadd.f32 %v739_v39, %v253_v31  ;;  %v292_v50 = vadd.f32 %v739_v39, %v254_v35  ;;  %v220_v29 = vld [vmem:[%s708_s25 + $0x98] sm:$0xff]  ;;  %v222_v35 = vld [vmem:[%s708_s25 + $0xa8] sm:$0xff] }
  0x24   : > { %v293_v51 = vadd.f32 %v739_v39, %v255_v36  ;;  %v294_v52 = vadd.f32 %v739_v39, %v256_v37  ;;  %v295_v53 = vadd.f32 %v739_v39, %v257_v38  ;;  %v296_v54 = vadd.f32 %v739_v39, %v258_v40 }
  0x25   : > { %v321_v55 = vmax.f32 %v289_v47, 0.0  ;;  %v322_v56 = vmax.f32 %v290_v48, 0.0  ;;  %v323_v57 = vmax.f32 %v291_v49, 0.0  ;;  %v324_v58 = vmax.f32 %v292_v50, 0.0 }
  0x26   : > { %v325_v59 = vmax.f32 %v293_v51, 0.0  ;;  %v326_v60 = vmax.f32 %v294_v52, 0.0  ;;  %v327_v61 = vmax.f32 %v295_v53, 0.0  ;;  %v328_v62 = vmax.f32 %v296_v54, 0.0 }
  0x27   : > { %v613_v63 = vpack.c.bf16 %v321_v55, %v321_v55  ;;  %v614_v0 = vpack.c.bf16 %v322_v56, %v322_v56  ;;  %v615_v1 = vpack.c.bf16 %v323_v57, %v323_v57  ;;  %v616_v2 = vpack.c.bf16 %v324_v58, %v324_v58 }
  0x28   : > { %v617_v5 = vpack.c.bf16 %v325_v59, %v325_v59  ;;  %v618_v6 = vpack.c.bf16 %v326_v60, %v326_v60  ;;  %v619_v7 = vpack.c.bf16 %v327_v61, %v327_v61  ;;  %v620_v8 = vpack.c.bf16 %v328_v62, %v328_v62 }
  0x29   : > { %482 = vst.msk [vmem:[%s760_s7] sm:$0xf] %vm481_vm0, %v613_v63  ;;  %483 = vst.msk [vmem:[%s760_s7 + $0x4] sm:$0xf] %vm481_vm0, %v614_v0  ;;  %v297_v9 = vadd.f32 %v739_v39, %v259_v41  ;;  %v298_v10 = vadd.f32 %v739_v39, %v260_v42  ;;  %v299_v11 = vadd.f32 %v739_v39, %v261_v43  ;;  %v225_v63 = vld [vmem:[%s708_s25 + $0xc0] sm:$0xff] }
  0x2a   : > { %484 = vst.msk [vmem:[%s760_s7 + $0x8] sm:$0xf] %vm481_vm0, %v615_v1  ;;  %485 = vst.msk [vmem:[%s760_s7 + $0xc] sm:$0xf] %vm481_vm0, %v616_v2  ;;  %v300_v12 = vadd.f32 %v739_v39, %v262_v44  ;;  %v301_v13 = vadd.f32 %v739_v39, %v263_v45  ;;  %v302_v14 = vadd.f32 %v739_v39, %v264_v46  ;;  %v223_v45 = vld [vmem:[%s708_s25 + $0xb0] sm:$0xff]  ;;  %v224_v46 = vld [vmem:[%s708_s25 + $0xb8] sm:$0xff] }
  0x2b   : > { %486 = vst.msk [vmem:[%s760_s7 + $0x10] sm:$0xf] %vm481_vm0, %v617_v5  ;;  %487 = vst.msk [vmem:[%s760_s7 + $0x14] sm:$0xf] %vm481_vm0, %v618_v6  ;;  %v265_v15 = vmul.f32 %v721_v21, %v215_v3  ;;  %v266_v16 = vmul.f32 %v721_v21, %v216_v4  ;;  %v329_v17 = vmax.f32 %v297_v9, 0.0  ;;  %v330_v18 = vmax.f32 %v298_v10, 0.0 }
  0x2c   : > { %488 = vst.msk [vmem:[%s760_s7 + $0x18] sm:$0xf] %vm481_vm0, %v619_v7  ;;  %489 = vst.msk [vmem:[%s760_s7 + $0x1c] sm:$0xf] %vm481_vm0, %v620_v8  ;;  %v331_v19 = vmax.f32 %v299_v11, 0.0  ;;  %v332_v20 = vmax.f32 %v300_v12, 0.0  ;;  %v267_v41 = vmul.f32 %v721_v21, %v217_v22  ;;  %v268_v42 = vmul.f32 %v721_v21, %v218_v27 }
  0x2d   : > { %v333_v23 = vmax.f32 %v301_v13, 0.0  ;;  %v334_v24 = vmax.f32 %v302_v14, 0.0  ;;  %v303_v25 = vadd.f32 %v739_v39, %v265_v15  ;;  %v304_v26 = vadd.f32 %v739_v39, %v266_v16  ;;  %v226_v4 = vld [vmem:[%s708_s25 + $0xc8] sm:$0xff]  ;;  %v227_v5 = vld [vmem:[%s708_s25 + $0xd0] sm:$0xff]  ;;  %v228_v6 = vld [vmem:[%s708_s25 + $0xd8] sm:$0xff] }
  0x2e   : > { %v621_v30 = vpack.c.bf16 %v329_v17, %v329_v17  ;;  %v622_v31 = vpack.c.bf16 %v330_v18, %v330_v18  ;;  %v623_v32 = vpack.c.bf16 %v331_v19, %v331_v19  ;;  %v624_v33 = vpack.c.bf16 %v332_v20, %v332_v20  ;;  %v229_v11 = vld [vmem:[%s708_s25 + $0xe0] sm:$0xff]  ;;  %v230_v12 = vld [vmem:[%s708_s25 + $0xe8] sm:$0xff]  ;;  %v231_v22 = vld [vmem:[%s708_s25 + $0xf0] sm:$0xff] }
  0x2f   : > { %v625_v36 = vpack.c.bf16 %v333_v23, %v333_v23  ;;  %v626_v37 = vpack.c.bf16 %v334_v24, %v334_v24  ;;  %v335_v38 = vmax.f32 %v303_v25, 0.0  ;;  %v336_v40 = vmax.f32 %v304_v26, 0.0  ;;  %v232_v23 = vld [vmem:[%s708_s25 + $0xf8] sm:$0xff] }
  0x30   : > { %490 = vst.msk [vmem:[%s760_s7 + $0x20] sm:$0xf] %vm481_vm0, %v621_v30  ;;  %491 = vst.msk [vmem:[%s760_s7 + $0x24] sm:$0xf] %vm481_vm0, %v622_v31  ;;  %v269_v43 = vmul.f32 %v721_v21, %v219_v28  ;;  %v270_v44 = vmul.f32 %v721_v21, %v220_v29  ;;  %v271_v49 = vmul.f32 %v721_v21, %v221_v34 }
  0x31   : > { %492 = vst.msk [vmem:[%s760_s7 + $0x28] sm:$0xf] %vm481_vm0, %v623_v32  ;;  %493 = vst.msk [vmem:[%s760_s7 + $0x2c] sm:$0xf] %vm481_vm0, %v624_v33  ;;  %v627_v47 = vpack.c.bf16 %v335_v38, %v335_v38  ;;  %v628_v48 = vpack.c.bf16 %v336_v40, %v336_v40  ;;  %v272_v50 = vmul.f32 %v721_v21, %v222_v35 }
  0x32   : > { %494 = vst.msk [vmem:[%s760_s7 + $0x30] sm:$0xf] %vm481_vm0, %v625_v36  ;;  %495 = vst.msk [vmem:[%s760_s7 + $0x34] sm:$0xf] %vm481_vm0, %v626_v37  ;;  %v305_v51 = vadd.f32 %v739_v39, %v267_v41  ;;  %v306_v52 = vadd.f32 %v739_v39, %v268_v42  ;;  %v307_v53 = vadd.f32 %v739_v39, %v269_v43 }
  0x33   : > { %v308_v54 = vadd.f32 %v739_v39, %v270_v44  ;;  %496 = vst.msk [vmem:[%s760_s7 + $0x38] sm:$0xf] %vm481_vm0, %v627_v47  ;;  %497 = vst.msk [vmem:[%s760_s7 + $0x3c] sm:$0xf] %vm481_vm0, %v628_v48  ;;  %v309_v55 = vadd.f32 %v739_v39, %v271_v49  ;;  %v310_v56 = vadd.f32 %v739_v39, %v272_v50 }
  0x34   : > { %v273_v57 = vmul.f32 %v721_v21, %v223_v45  ;;  %v274_v58 = vmul.f32 %v721_v21, %v224_v46  ;;  %v337_v59 = vmax.f32 %v305_v51, 0.0  ;;  %v338_v60 = vmax.f32 %v306_v52, 0.0 }
  0x35   : > { %v339_v61 = vmax.f32 %v307_v53, 0.0  ;;  %v340_v62 = vmax.f32 %v308_v54, 0.0  ;;  %v341_v0 = vmax.f32 %v309_v55, 0.0  ;;  %v342_v1 = vmax.f32 %v310_v56, 0.0 }
  0x36   : > { %v311_v2 = vadd.f32 %v739_v39, %v273_v57  ;;  %v312_v3 = vadd.f32 %v739_v39, %v274_v58  ;;  %v629_v7 = vpack.c.bf16 %v337_v59, %v337_v59  ;;  %v630_v8 = vpack.c.bf16 %v338_v60, %v338_v60 }
  0x37   : > { %v631_v9 = vpack.c.bf16 %v339_v61, %v339_v61  ;;  %v632_v10 = vpack.c.bf16 %v340_v62, %v340_v62  ;;  %v633_v13 = vpack.c.bf16 %v341_v0, %v341_v0  ;;  %v634_v14 = vpack.c.bf16 %v342_v1, %v342_v1 }
  0x38   : > { %v343_v15 = vmax.f32 %v311_v2, 0.0  ;;  %v344_v16 = vmax.f32 %v312_v3, 0.0  ;;  %498 = vst.msk [vmem:[%s760_s7 + $0x40] sm:$0xf] %vm481_vm0, %v629_v7  ;;  %499 = vst.msk [vmem:[%s760_s7 + $0x44] sm:$0xf] %vm481_vm0, %v630_v8  ;;  %v275_v17 = vmul.f32 %v721_v21, %v225_v63  ;;  %v276_v18 = vmul.f32 %v721_v21, %v226_v4 }
  0x39   : > { %500 = vst.msk [vmem:[%s760_s7 + $0x48] sm:$0xf] %vm481_vm0, %v631_v9  ;;  %501 = vst.msk [vmem:[%s760_s7 + $0x4c] sm:$0xf] %vm481_vm0, %v632_v10  ;;  %v277_v19 = vmul.f32 %v721_v21, %v227_v5  ;;  %v278_v20 = vmul.f32 %v721_v21, %v228_v6  ;;  %v279_v26 = vmul.f32 %v721_v21, %v229_v11 }
  0x3a   : > { %502 = vst.msk [vmem:[%s760_s7 + $0x50] sm:$0xf] %vm481_vm0, %v633_v13  ;;  %503 = vst.msk [vmem:[%s760_s7 + $0x54] sm:$0xf] %vm481_vm0, %v634_v14  ;;  %v635_v24 = vpack.c.bf16 %v343_v15, %v343_v15  ;;  %v636_v25 = vpack.c.bf16 %v344_v16, %v344_v16  ;;  %v280_v27 = vmul.f32 %v721_v21, %v230_v12 }
  0x3b   : > { %v313_v28 = vadd.f32 %v739_v39, %v275_v17  ;;  %v314_v29 = vadd.f32 %v739_v39, %v276_v18  ;;  %v315_v30 = vadd.f32 %v739_v39, %v277_v19  ;;  %v316_v31 = vadd.f32 %v739_v39, %v278_v20 }
  0x3c   : > { %504 = vst.msk [vmem:[%s760_s7 + $0x58] sm:$0xf] %vm481_vm0, %v635_v24  ;;  %505 = vst.msk [vmem:[%s760_s7 + $0x5c] sm:$0xf] %vm481_vm0, %v636_v25  ;;  %v317_v32 = vadd.f32 %v739_v39, %v279_v26  ;;  %v318_v33 = vadd.f32 %v739_v39, %v280_v27  ;;  %v281_v34 = vmul.f32 %v721_v21, %v231_v22 }
  0x3d   : > { %v282_v35 = vmul.f32 %v721_v21, %v232_v23  ;;  %v345_v36 = vmax.f32 %v313_v28, 0.0  ;;  %v346_v37 = vmax.f32 %v314_v29, 0.0  ;;  %v347_v38 = vmax.f32 %v315_v30, 0.0 }
  0x3e   : > { %v348_v40 = vmax.f32 %v316_v31, 0.0  ;;  %v349_v41 = vmax.f32 %v317_v32, 0.0  ;;  %v350_v42 = vmax.f32 %v318_v33, 0.0  ;;  %v319_v43 = vadd.f32 %v739_v39, %v281_v34 }
  0x3f   : > { %v320_v44 = vadd.f32 %v739_v39, %v282_v35  ;;  %v637_v45 = vpack.c.bf16 %v345_v36, %v345_v36  ;;  %v638_v46 = vpack.c.bf16 %v346_v37, %v346_v37  ;;  %v639_v21 = vpack.c.bf16 %v347_v38, %v347_v38 }
  0x40   : > { %v640_v47 = vpack.c.bf16 %v348_v40, %v348_v40  ;;  %v641_v48 = vpack.c.bf16 %v349_v41, %v349_v41  ;;  %v642_v49 = vpack.c.bf16 %v350_v42, %v350_v42  ;;  %v351_v50 = vmax.f32 %v319_v43, 0.0 }
  0x41   : > { %v352_v51 = vmax.f32 %v320_v44, 0.0  ;;  %506 = vst.msk [vmem:[%s760_s7 + $0x60] sm:$0xf] %vm481_vm0, %v637_v45  ;;  %507 = vst.msk [vmem:[%s760_s7 + $0x64] sm:$0xf] %vm481_vm0, %v638_v46 }
  0x42   : > { %508 = vst.msk [vmem:[%s760_s7 + $0x68] sm:$0xf] %vm481_vm0, %v639_v21  ;;  %509 = vst.msk [vmem:[%s760_s7 + $0x6c] sm:$0xf] %vm481_vm0, %v640_v47  ;;  %v643_v39 = vpack.c.bf16 %v351_v50, %v351_v50 }
  0x43   : > { %510 = vst.msk [vmem:[%s760_s7 + $0x70] sm:$0xf] %vm481_vm0, %v641_v48  ;;  %511 = vst.msk [vmem:[%s760_s7 + $0x74] sm:$0xf] %vm481_vm0, %v642_v49  ;;  %v644_v52 = vpack.c.bf16 %v352_v51, %v352_v51 }
  0x44   : > { %512 = vst.msk [vmem:[%s760_s7 + $0x78] sm:$0xf] %vm481_vm0, %v643_v39 }
  0x45   : > { %513 = vst.msk [vmem:[%s760_s7 + $0x7c] sm:$0xf] %vm481_vm0, %v644_v52 }
  0x46 PF: > { %s14_s15 = sadd.s32 1, %s661_s15  }
  0x47   : > { %p11_p4 = scmp.ge.s32.totalorder %s14_s15, 4  }
  0x49   :  { %13 = sbr.rel (!%p11_p4) target bundleno = 1 (0x1), region = 66 }

// kernel: bottleneck_forward.6
= control target key start
LH: loop header
LB: loop body
LE: loop exit
PB: predicated region body
PF: predicated region fallthrough
CT: control target
= control target key end

     0   :  { %s934_s12 = smov 0   ;;  %s1232_s0 = inlined_call_operand.vmem [shape: bf16[512,16], index: 0, kind: input, shape index: {}]   ;;  %s1233_s1 = inlined_call_operand.vmem [shape: bf16[16,8], index: 1, kind: input, shape index: {}]   ;;  %s1234_s2 = inlined_call_operand.vmem [shape: f32[512,8], index: 2, kind: output, shape index: {0}]   ;;  %s1235_s3 = inlined_call_operand.vmem [shape: f32[2,8], index: 3, kind: output, shape index: {1}]  }
   0x1 LB: > { %s781_s13 = sadd.s32 4294967295, %s911_s12   ;;  %p785_p0 = scmp.ge.s32.totalorder %s911_s12, 1  ;;  %s911_s12 = sphi %s934_s12, %s14_s12  }
   0x2   : > { %p136_p1 = scmp.lt.s32.totalorder %s911_s12, 3 }
   0x4   : > { %p137_p2 = pnand %p785_p0, %p136_p1 }
   0x5   : > { %s786_s14 = sshll.u32 (!%p137_p2), %s781_s13, 5  ;;  %p790_p4 = scmp.ne.s32.totalorder (!%p137_p2), %s781_s13, 0 }
   0x6   : > { %140 = sbr.rel (%p137_p2) target bundleno = 320 (0x140), region = 28  ;;  %p161_p3 = scmp.lt.s32.totalorder (!%p137_p2), %s786_s14, 63 }
   0xd   : > { %s1237_s14 = smov (!%p161_p3, %s786_s14), 63  ;;  %176 = sbr.rel (%p790_p4) target bundleno = 20 (0x14), region = 32 }
   0xe   : > { %s787_s15 = sshll.u32 %s1237_s14, 2  ;;  %s789_s16 = sshll.u32 %s1237_s14, 3  ;;  %vm177_vm0 = vcmask (!%p790_p4), 58368   ;;  %v913_v0 = vmov (!%p790_p4), 0.0  }
   0xf   : > { %s945_s19 = scalar_lea.vmem %s1232_s0, %s787_s15  ;;  %s950_s22 = scalar_lea.vmem %s1234_s2, %s789_s16  ;;  %178 = vst.msk [vmem:[%s1235_s3] sm:$0x3] (!%p790_p4), %vm177_vm0, %v913_v0 }
  0x14 PF: > { %v888_v1 = vld [vmem:[%s1233_s1] sm:$0xff]   ;;  %vm299_vm1 = vcmask 130048   ;;  %v890_v3 = vld [vmem:[%s945_s19 + $0x8] sm:$0xff]   ;;  %v891_v4 = vld [vmem:[%s945_s19 + $0x10] sm:$0xff]   ;;  %vm509_vm2 = vcmask 64512   ;;  %vm613_vm3 = vcmask 57344  }
  0x15   : > { %v889_v2 = vld [vmem:[%s945_s19] sm:$0xff]   ;;  %843 = vmatprep.subr.bf16.mxu0 %v888_v1  ;;  %877 = vmatprep.subr.bf16.mxu1 %v888_v1  ;;  %v892_v5 = vld [vmem:[%s945_s19 + $0x18] sm:$0xff]   ;;  %v898_v8 = vld [vmem:[%s945_s19 + $0x48] sm:$0xff]  }
  0x16   : > { %844 = vmatpush3.bf16.msra.mxu0 %v888_v1  ;;  %845 = vmatprep.mubr.msk.bf16.mxu0 %vm299_vm1, %v889_v2  ;;  %v893_v6 = vld [vmem:[%s945_s19 + $0x20] sm:$0xff]   ;;  %v899_v9 = vld [vmem:[%s945_s19 + $0x50] sm:$0xff]   ;;  %v900_v10 = vld [vmem:[%s945_s19 + $0x58] sm:$0xff]  }
  0x17   : > { %878 = vmatpush3.bf16.msra.mxu1 %v888_v1  ;;  %v897_v7 = vld [vmem:[%s945_s19 + $0x40] sm:$0xff]   ;;  %v894_v12 = vld [vmem:[%s945_s19 + $0x28] sm:$0xff]   ;;  %v895_v13 = vld [vmem:[%s945_s19 + $0x30] sm:$0xff]  }
  0x18   : > { %861 = vmatprep.mubr.msk.bf16.mxu1 %vm299_vm1, %v897_v7  ;;  %v901_v11 = vld [vmem:[%s945_s19 + $0x60] sm:$0xff]   ;;  %v902_v14 = vld [vmem:[%s945_s19 + $0x68] sm:$0xff]   ;;  %v903_v15 = vld [vmem:[%s945_s19 + $0x70] sm:$0xff]  }
  0x19   : > { %846 = vmatmul.mubr.msk.bf16.vlgmr.msra.gmra.mrb[0].mxu0 %vm299_vm1, %v890_v3  ;;  %v896_v16 = vld [vmem:[%s945_s19 + $0x38] sm:$0xff]  }
  0x1a   : > { %849 = vmatprep.mubr.msk.bf16.mxu0 %vm299_vm1, %v891_v4  ;;  %862 = vmatmul.mubr.msk.bf16.vlgmr.msra.gmra.mrb[0].mxu1 %vm299_vm1, %v898_v8  ;;  %v904_v17 = vld [vmem:[%s945_s19 + $0x78] sm:$0xff]  }
  0x1b   : > { %865 = vmatprep.mubr.msk.bf16.mxu1 %vm299_vm1, %v899_v9 }
  0x21   : > { %850 = vmatmul.mubr.msk.bf16.gmra.mrb[4].mxu0 %vm299_vm1, %v892_v5 }
  0x22   : > { %853 = vmatprep.mubr.msk.bf16.mxu0 %vm299_vm1, %v893_v6  ;;  %866 = vmatmul.mubr.msk.bf16.gmra.mrb[4].mxu1 %vm299_vm1, %v900_v10 }
  0x23   : > { %869 = vmatprep.mubr.msk.bf16.mxu1 %vm299_vm1, %v901_v11 }
  0x29   : > { %854 = vmatmul.mubr.msk.bf16.gmra.mrb[8].mxu0 %vm299_vm1, %v894_v12 }
  0x2a   : > { %857 = vmatprep.mubr.msk.bf16.mxu0 %vm299_vm1, %v895_v13  ;;  %870 = vmatmul.mubr.msk.bf16.gmra.mrb[8].mxu1 %vm299_vm1, %v902_v14 }
  0x2b   : > { %873 = vmatprep.mubr.msk.bf16.mxu1 %vm299_vm1, %v903_v15 }
  0x31   : > { %858 = vmatmul.mubr.msk.bf16.gmra.mrb[12].mxu0 %vm299_vm1, %v896_v16 }
  0x32   : > { %874 = vmatmul.mubr.msk.bf16.gmra.mrb[12].mxu1 %vm299_vm1, %v904_v17 }
  0xec   : > { %v847_v18 = vpop.f32.mrb[0].mxu0 }
  0xed   : > { %512 = vst.msk [vmem:[%s950_s22 + $0x10] sm:$0xff] %vm509_vm2, %v847_v18  ;;  %v382_v19 = vpop.f32.mrb[1].mxu0  ;;  %v618_v23 = vmul.f32 %v847_v18, %v847_v18  ;;  %v546_v28 = vsel %vm509_vm2, %v847_v18, 0.0  ;;  %v1003_v32 = vpop.f32.mrb[0].mxu1 }
  0xee   : > { %510 = vst.msk [vmem:[%s950_s22] sm:$0xff] %vm509_vm2, %v382_v19  ;;  %v616_v20 = vmul.f32 %v382_v19, %v382_v19  ;;  %v848_v21 = vpop.f32.mrb[2].mxu0  ;;  %v543_v24 = vsel %vm509_vm2, %v382_v19, 0.0  ;;  %528 = vst.msk [vmem:[%s950_s22 + $0x90] sm:$0xff] %vm509_vm2, %v1003_v32  ;;  %v1008_v35 = vpop.f32.mrb[1].mxu1 }
  0xef   : > { %513 = vst.msk [vmem:[%s950_s22 + $0x18] sm:$0xff] %vm509_vm2, %v848_v21  ;;  %v385_v22 = vpop.f32.mrb[3].mxu0  ;;  %v619_v30 = vmul.f32 %v848_v21, %v848_v21  ;;  %v651_v36 = vsel %vm509_vm2, %v618_v23, 0.0  ;;  %v548_v37 = vsel %vm509_vm2, %v848_v21, 0.0  ;;  %526 = vst.msk [vmem:[%s950_s22 + $0x80] sm:$0xff] %vm509_vm2, %v1008_v35  ;;  %v1015_v39 = vpop.f32.mrb[2].mxu1 }
  0xf0   : > { %511 = vst.msk [vmem:[%s950_s22 + $0x8] sm:$0xff] %vm509_vm2, %v385_v22  ;;  %v544_v25 = vsel %vm509_vm2, %v385_v22, 0.0  ;;  %v617_v26 = vmul.f32 %v385_v22, %v385_v22  ;;  %v648_v29 = vsel %vm509_vm2, %v616_v20, 0.0  ;;  %529 = vst.msk [vmem:[%s950_s22 + $0x98] sm:$0xff] %vm509_vm2, %v1015_v39  ;;  %v1022_v43 = vpop.f32.mrb[3].mxu1 }
  0xf1   : > { %v545_v27 = vadd.f32 %v544_v25, %v543_v24  ;;  %v653_v44 = vsel %vm509_vm2, %v619_v30, 0.0  ;;  %527 = vst.msk [vmem:[%s950_s22 + $0x88] sm:$0xff] %vm509_vm2, %v1022_v43 }
  0xf2   : > { %v649_v31 = vsel %vm509_vm2, %v617_v26, 0.0 }
  0xf3   : > { %v547_v33 = vadd.f32 %v546_v28, %v545_v27  ;;  %v650_v34 = vadd.f32 %v649_v31, %v648_v29 }
  0xf4   : > { %v851_v38 = vpop.f32.mrb[4].mxu0 }
  0xf5   : > { %v652_v40 = vadd.f32 %v651_v36, %v650_v34  ;;  %516 = vst.msk [vmem:[%s950_s22 + $0x30] sm:$0xff] %vm509_vm2, %v851_v38  ;;  %v398_v41 = vpop.f32.mrb[5].mxu0  ;;  %v549_v42 = vadd.f32 %v548_v37, %v547_v33  ;;  %v622_v51 = vmul.f32 %v851_v38, %v851_v38  ;;  %v554_v57 = vsel %vm509_vm2, %v851_v38, 0.0  ;;  %v1039_v60 = vpop.f32.mrb[4].mxu1 }
  0xf6   : > { %514 = vst.msk [vmem:[%s950_s22 + $0x20] sm:$0xff] %vm509_vm2, %v398_v41  ;;  %v550_v45 = vsel %vm509_vm2, %v398_v41, 0.0  ;;  %v620_v46 = vmul.f32 %v398_v41, %v398_v41  ;;  %v852_v47 = vpop.f32.mrb[6].mxu0  ;;  %532 = vst.msk [vmem:[%s950_s22 + $0xb0] sm:$0xff] %vm509_vm2, %v1039_v60  ;;  %v1044_v63 = vpop.f32.mrb[5].mxu1 }
  0xf7   : > { %v551_v48 = vadd.f32 %v550_v45, %v549_v42  ;;  %v654_v49 = vadd.f32 %v653_v44, %v652_v40  ;;  %517 = vst.msk [vmem:[%s950_s22 + $0x38] sm:$0xff] %vm509_vm2, %v852_v47  ;;  %v401_v50 = vpop.f32.mrb[7].mxu0  ;;  %v623_v58 = vmul.f32 %v852_v47, %v852_v47  ;;  %v659_v0 = vsel %vm509_vm2, %v622_v51, 0.0  ;;  %530 = vst.msk [vmem:[%s950_s22 + $0xa0] sm:$0xff] %vm509_vm2, %v1044_v63  ;;  %v1051_v3 = vpop.f32.mrb[6].mxu1 }
  0xf8   : > { %v655_v52 = vsel %vm509_vm2, %v620_v46, 0.0  ;;  %515 = vst.msk [vmem:[%s950_s22 + $0x28] sm:$0xff] %vm509_vm2, %v401_v50  ;;  %v552_v53 = vsel %vm509_vm2, %v401_v50, 0.0  ;;  %v621_v54 = vmul.f32 %v401_v50, %v401_v50  ;;  %v556_v1 = vsel %vm509_vm2, %v852_v47, 0.0  ;;  %533 = vst.msk [vmem:[%s950_s22 + $0xb8] sm:$0xff] %vm509_vm2, %v1051_v3  ;;  %v1058_v7 = vpop.f32.mrb[7].mxu1 }
  0xf9   : > { %v656_v55 = vadd.f32 %v655_v52, %v654_v49  ;;  %v553_v56 = vadd.f32 %v552_v53, %v551_v48  ;;  %v661_v8 = vsel %vm509_vm2, %v623_v58, 0.0  ;;  %531 = vst.msk [vmem:[%s950_s22 + $0xa8] sm:$0xff] %vm509_vm2, %v1058_v7 }
  0xfa   : > { %v657_v59 = vsel %vm509_vm2, %v621_v54, 0.0 }
  0xfb   : > { %v555_v61 = vadd.f32 %v554_v57, %v553_v56  ;;  %v658_v62 = vadd.f32 %v657_v59, %v656_v55  ;;  %v632_v56 = vmul.f32 %v1008_v35, %v1008_v35 }
  0xfc   : > { %v855_v2 = vpop.f32.mrb[8].mxu0 }
  0xfd   : > { %v660_v4 = vadd.f32 %v659_v0, %v658_v62  ;;  %520 = vst.msk [vmem:[%s950_s22 + $0x50] sm:$0xff] %vm509_vm2, %v855_v2  ;;  %v414_v5 = vpop.f32.mrb[9].mxu0  ;;  %v557_v6 = vadd.f32 %v556_v1, %v555_v61  ;;  %v626_v15 = vmul.f32 %v855_v2, %v855_v2  ;;  %v562_v21 = vsel %vm509_vm2, %v855_v2, 0.0  ;;  %v1075_v24 = vpop.f32.mrb[8].mxu1 }
  0xfe   : > { %518 = vst.msk [vmem:[%s950_s22 + $0x40] sm:$0xff] %vm509_vm2, %v414_v5  ;;  %v558_v9 = vsel %vm509_vm2, %v414_v5, 0.0  ;;  %v624_v10 = vmul.f32 %v414_v5, %v414_v5  ;;  %v856_v11 = vpop.f32.mrb[10].mxu0  ;;  %536 = vst.msk [vmem:[%s950_s22 + $0xd0] sm:$0xff] %vm509_vm2, %v1075_v24  ;;  %v1080_v27 = vpop.f32.mrb[9].mxu1  ;;  %v574_v1 = vsel %vm509_vm2, %v1008_v35, 0.0  ;;  %v633_v35 = vmul.f32 %v1022_v43, %v1022_v43 }
  0xff   : > { %v559_v12 = vadd.f32 %v558_v9, %v557_v6  ;;  %v662_v13 = vadd.f32 %v661_v8, %v660_v4  ;;  %521 = vst.msk [vmem:[%s950_s22 + $0x58] sm:$0xff] %vm509_vm2, %v856_v11  ;;  %v417_v14 = vpop.f32.mrb[11].mxu0  ;;  %v627_v22 = vmul.f32 %v856_v11, %v856_v11  ;;  %v667_v28 = vsel %vm509_vm2, %v626_v15, 0.0  ;;  %534 = vst.msk [vmem:[%s950_s22 + $0xc0] sm:$0xff] %vm509_vm2, %v1080_v27  ;;  %v1087_v31 = vpop.f32.mrb[10].mxu1 }
 0x100   : > { %v663_v16 = vsel %vm509_vm2, %v624_v10, 0.0  ;;  %519 = vst.msk [vmem:[%s950_s22 + $0x48] sm:$0xff] %vm509_vm2, %v417_v14  ;;  %v560_v17 = vsel %vm509_vm2, %v417_v14, 0.0  ;;  %v625_v18 = vmul.f32 %v417_v14, %v417_v14  ;;  %v564_v29 = vsel %vm509_vm2, %v856_v11, 0.0  ;;  %537 = vst.msk [vmem:[%s950_s22 + $0xd8] sm:$0xff] %vm509_vm2, %v1087_v31  ;;  %v1094_v37 = vpop.f32.mrb[11].mxu1 }
 0x101   : > { %v664_v19 = vadd.f32 %v663_v16, %v662_v13  ;;  %v561_v20 = vadd.f32 %v560_v17, %v559_v12  ;;  %v669_v38 = vsel %vm509_vm2, %v627_v22, 0.0  ;;  %535 = vst.msk [vmem:[%s950_s22 + $0xc8] sm:$0xff] %vm509_vm2, %v1094_v37  ;;  %v679_v10 = vsel %vm509_vm2, %v632_v56, 0.0 }
 0x102   : > { %v665_v23 = vsel %vm509_vm2, %v625_v18, 0.0  ;;  %v634_v14 = vmul.f32 %v1003_v32, %v1003_v32  ;;  %v576_v15 = vsel %vm509_vm2, %v1022_v43, 0.0  ;;  %v578_v18 = vsel %vm509_vm2, %v1003_v32, 0.0 }
 0x103   : > { %v563_v25 = vadd.f32 %v562_v21, %v561_v20  ;;  %v666_v26 = vadd.f32 %v665_v23, %v664_v19  ;;  %v635_v19 = vmul.f32 %v1015_v39, %v1015_v39  ;;  %v681_v20 = vsel %vm509_vm2, %v633_v35, 0.0 }
 0x104   : > { %v859_v30 = vpop.f32.mrb[12].mxu0  ;;  %v636_v21 = vmul.f32 %v1044_v63, %v1044_v63  ;;  %v580_v43 = vsel %vm509_vm2, %v1015_v39, 0.0  ;;  %v584_v39 = vsel %vm509_vm2, %v1058_v7, 0.0  ;;  %v642_v56 = vmul.f32 %v1075_v24, %v1075_v24 }
 0x105   : > { %v668_v33 = vadd.f32 %v667_v28, %v666_v26  ;;  %524 = vst.msk [vmem:[%s950_s22 + $0x70] sm:$0xff] %vm509_vm2, %v859_v30  ;;  %v430_v34 = vpop.f32.mrb[13].mxu0  ;;  %v565_v36 = vadd.f32 %v564_v29, %v563_v25  ;;  %v630_v47 = vmul.f32 %v859_v30, %v859_v30  ;;  %v570_v53 = vsel %vm509_vm2, %v859_v30, 0.0  ;;  %v1113_v57 = vpop.f32.mrb[12].mxu1 }
 0x106   : > { %522 = vst.msk [vmem:[%s950_s22 + $0x60] sm:$0xff] %vm509_vm2, %v430_v34  ;;  %v566_v40 = vsel %vm509_vm2, %v430_v34, 0.0  ;;  %v628_v41 = vmul.f32 %v430_v34, %v430_v34  ;;  %v860_v42 = vpop.f32.mrb[14].mxu0  ;;  %540 = vst.msk [vmem:[%s950_s22 + $0xf0] sm:$0xff] %vm509_vm2, %v1113_v57  ;;  %v1118_v61 = vpop.f32.mrb[13].mxu1  ;;  %v683_v25 = vsel %vm509_vm2, %v634_v14, 0.0 }
 0x107   : > { %v567_v44 = vadd.f32 %v566_v40, %v565_v36  ;;  %v670_v45 = vadd.f32 %v669_v38, %v668_v33  ;;  %525 = vst.msk [vmem:[%s950_s22 + $0x78] sm:$0xff] %vm509_vm2, %v860_v42  ;;  %v433_v46 = vpop.f32.mrb[15].mxu0  ;;  %v631_v54 = vmul.f32 %v860_v42, %v860_v42  ;;  %v675_v62 = vsel %vm509_vm2, %v630_v47, 0.0  ;;  %538 = vst.msk [vmem:[%s950_s22 + $0xe0] sm:$0xff] %vm509_vm2, %v1118_v61  ;;  %v1127_v2 = vpop.f32.mrb[14].mxu1 }
 0x108   : > { %v671_v48 = vsel %vm509_vm2, %v628_v41, 0.0  ;;  %523 = vst.msk [vmem:[%s950_s22 + $0x68] sm:$0xff] %vm509_vm2, %v433_v46  ;;  %v568_v49 = vsel %vm509_vm2, %v433_v46, 0.0  ;;  %v629_v50 = vmul.f32 %v433_v46, %v433_v46  ;;  %v572_v0 = vsel %vm509_vm2, %v860_v42, 0.0  ;;  %541 = vst.msk [vmem:[%s950_s22 + $0xf8] sm:$0xff] %vm509_vm2, %v1127_v2  ;;  %v1134_v8 = vpop.f32.mrb[15].mxu1 }
 0x109   : > { %v672_v51 = vadd.f32 %v671_v48, %v670_v45  ;;  %v569_v52 = vadd.f32 %v568_v49, %v567_v44  ;;  %v647_v6 = vmul.f32 %v1127_v2, %v1127_v2  ;;  %v677_v9 = vsel %vm509_vm2, %v631_v54, 0.0  ;;  %539 = vst.msk [vmem:[%s950_s22 + $0xe8] sm:$0xff] %vm509_vm2, %v1134_v8 }
 0x10a   : > { %v673_v55 = vsel %vm509_vm2, %v629_v50, 0.0  ;;  %v582_v26 = vsel %vm509_vm2, %v1044_v63, 0.0  ;;  %v685_v29 = vsel %vm509_vm2, %v635_v19, 0.0  ;;  %v687_v30 = vsel %vm509_vm2, %v636_v21, 0.0 }
 0x10b   : > { %v571_v58 = vadd.f32 %v570_v53, %v569_v52  ;;  %v674_v59 = vadd.f32 %v673_v55, %v672_v51  ;;  %v1144_v13 = vsel %vm509_vm2, %v647_v6, 0.0  ;;  %v637_v33 = vmul.f32 %v1058_v7, %v1058_v7 }
 0x10c   : > { %v638_v38 = vmul.f32 %v1039_v60, %v1039_v60  ;;  %v586_v63 = vsel %vm509_vm2, %v1039_v60, 0.0  ;;  %v639_v42 = vmul.f32 %v1051_v3, %v1051_v3  ;;  %v640_v45 = vmul.f32 %v1080_v27, %v1080_v27 }
 0x10d   : > { %v676_v4 = vadd.f32 %v675_v62, %v674_v59  ;;  %v573_v5 = vadd.f32 %v572_v0, %v571_v58  ;;  %v689_v44 = vsel %vm509_vm2, %v637_v33, 0.0  ;;  %v588_v7 = vsel %vm509_vm2, %v1051_v3, 0.0 }
 0x10e   : > { %v691_v48 = vsel %vm509_vm2, %v638_v38, 0.0  ;;  %v590_v49 = vsel %vm509_vm2, %v1080_v27, 0.0  ;;  %v693_v51 = vsel %vm509_vm2, %v639_v42, 0.0  ;;  %v695_v52 = vsel %vm509_vm2, %v640_v45, 0.0  ;;  %v542_v38 = vld [vmem:[%s1235_s3] sm:$0x1] }
 0x10f   : > { %v575_v11 = vadd.f32 %v574_v1, %v573_v5  ;;  %v678_v12 = vadd.f32 %v677_v9, %v676_v4  ;;  %v641_v53 = vmul.f32 %v1094_v37, %v1094_v37  ;;  %v592_v3 = vsel %vm509_vm2, %v1094_v37, 0.0 }
 0x110   : > { %v594_v27 = vsel %vm509_vm2, %v1075_v24, 0.0  ;;  %v643_v62 = vmul.f32 %v1087_v31, %v1087_v31  ;;  %v644_v1 = vmul.f32 %v1118_v61, %v1118_v61  ;;  %v699_v6 = vsel %vm509_vm2, %v642_v56, 0.0 }
 0x111   : > { %v680_v16 = vadd.f32 %v679_v10, %v678_v12  ;;  %v577_v17 = vadd.f32 %v576_v15, %v575_v11  ;;  %v697_v0 = vsel %vm509_vm2, %v641_v53, 0.0  ;;  %v596_v37 = vsel %vm509_vm2, %v1087_v31, 0.0 }
 0x112   : > { %v598_v9 = vsel %vm509_vm2, %v1118_v61, 0.0  ;;  %v701_v35 = vsel %vm509_vm2, %v643_v62, 0.0  ;;  %v703_v11 = vsel %vm509_vm2, %v644_v1, 0.0  ;;  %v645_v12 = vmul.f32 %v1134_v8, %v1134_v8 }
 0x113   : > { %v579_v22 = vadd.f32 %v578_v18, %v577_v17  ;;  %v682_v23 = vadd.f32 %v681_v20, %v680_v16  ;;  %v646_v16 = vmul.f32 %v1113_v57, %v1113_v57  ;;  %v600_v31 = vsel %vm509_vm2, %v1134_v8, 0.0 }
 0x114   : > { %v602_v61 = vsel %vm509_vm2, %v1113_v57, 0.0  ;;  %v705_v19 = vsel %vm509_vm2, %v645_v12, 0.0 }
 0x115   : > { %v684_v28 = vadd.f32 %v683_v25, %v682_v23  ;;  %v581_v32 = vadd.f32 %v580_v43, %v579_v22  ;;  %v707_v22 = vsel %vm509_vm2, %v646_v16, 0.0  ;;  %v604_v23 = vsel %vm509_vm2, %v1127_v2, 0.0  ;;  %v615_v2 = vld [vmem:[%s1235_s3 + $0x1] sm:$0x1] }
 0x117   : > { %v583_v34 = vadd.f32 %v582_v26, %v581_v32  ;;  %v686_v36 = vadd.f32 %v685_v29, %v684_v28 }
 0x119   : > { %v688_v40 = vadd.f32 %v687_v30, %v686_v36  ;;  %v585_v41 = vadd.f32 %v584_v39, %v583_v34 }
 0x11b   : > { %v587_v46 = vadd.f32 %v586_v63, %v585_v41  ;;  %v690_v47 = vadd.f32 %v689_v44, %v688_v40 }
 0x11d   : > { %v692_v50 = vadd.f32 %v691_v48, %v690_v47  ;;  %v589_v60 = vadd.f32 %v588_v7, %v587_v46 }
 0x11f   : > { %v591_v54 = vadd.f32 %v590_v49, %v589_v60  ;;  %v694_v55 = vadd.f32 %v693_v51, %v692_v50 }
 0x121   : > { %v696_v58 = vadd.f32 %v695_v52, %v694_v55  ;;  %v593_v59 = vadd.f32 %v592_v3, %v591_v54 }
 0x123   : > { %v595_v4 = vadd.f32 %v594_v27, %v593_v59  ;;  %v698_v5 = vadd.f32 %v697_v0, %v696_v58 }
 0x125   : > { %v700_v10 = vadd.f32 %v699_v6, %v698_v5  ;;  %v597_v24 = vadd.f32 %v596_v37, %v595_v4 }
 0x127   : > { %v599_v14 = vadd.f32 %v598_v9, %v597_v24  ;;  %v702_v15 = vadd.f32 %v701_v35, %v700_v10 }
 0x129   : > { %v704_v17 = vadd.f32 %v703_v11, %v702_v15  ;;  %v601_v18 = vadd.f32 %v600_v31, %v599_v14 }
 0x12b   : > { %v603_v20 = vadd.f32 %v602_v61, %v601_v18  ;;  %v706_v21 = vadd.f32 %v705_v19, %v704_v17 }
 0x12d   : > { %v605_v25 = vadd.f32 %v604_v23, %v603_v20  ;;  %v708_v43 = vadd.f32 %v707_v22, %v706_v21 }
 0x12f   : > { %v606_v26 = vrot.slane %v605_v25, 4  ;;  %v710_v28 = vadd.f32 %v1144_v13, %v708_v43 }
 0x131   : > { %v607_v8 = vadd.f32 %v606_v26, %v605_v25  ;;  %v711_v32 = vrot.slane %v710_v28, 4 }
 0x133   : > { %v608_v29 = vrot.slane %v607_v8, 2  ;;  %v712_v30 = vadd.f32 %v711_v32, %v710_v28 }
 0x135   : > { %v609_v33 = vadd.f32 %v608_v29, %v607_v8  ;;  %v713_v57 = vrot.slane %v712_v30, 2 }
 0x137   : > { %v610_v34 = vrot.slane %v609_v33, 1  ;;  %v714_v36 = vadd.f32 %v713_v57, %v712_v30 }
 0x139   : > { %v611_v39 = vadd.f32 %v610_v34, %v609_v33  ;;  %v715_v40 = vrot.slane %v714_v36, 1 }
 0x13b   : > { %v612_v13 = vadd.f32 %v611_v39, %v542_v38  ;;  %v716_v41 = vadd.f32 %v715_v40, %v714_v36 }
 0x13d   : > { %614 = vst.msk [vmem:[%s1235_s3] sm:$0x1] %vm613_vm3, %v612_v13  ;;  %v717_v63 = vadd.f32 %v716_v41, %v615_v2 }
 0x13f   : > { %718 = vst.msk [vmem:[%s1235_s3 + $0x1] sm:$0x1] %vm613_vm3, %v717_v63 }
 0x140 PF: > { %s14_s12 = sadd.s32 1, %s911_s12  }
 0x141   : > { %p11_p5 = scmp.ge.s32.totalorder %s14_s12, 4  }
 0x143   :  { %13 = sbr.rel (!%p11_p5) target bundleno = 1 (0x1), region = 70 }

// kernel: bottleneck_forward.8
= control target key start
LH: loop header
LB: loop body
LE: loop exit
PB: predicated region body
PF: predicated region fallthrough
CT: control target
= control target key end

     0   :  { %vm112_vm0 = vcmask 588800   ;;  %vm137_vm1 = vcmask 1043456   ;;  %vm18_vm2 = vcmask 58368   ;;  %v446_v14 = vmov 0.0   ;;  %s643_s1 = inlined_call_operand.vmem [shape: bf16[72,8], index: 1, kind: input, shape index: {}]   ;;  %s644_s0 = inlined_call_operand.vmem [shape: bf16[128,72], index: 0, kind: input, shape index: {}]   ;;  %s645_s3 = inlined_call_operand.vmem [shape: f32[2,8], index: 3, kind: output, shape index: {1}]   ;;  %s646_s2 = inlined_call_operand.vmem [shape: f32[128,8], index: 2, kind: output, shape index: {0}]  }
   0x1   :  { %v433_v0 = vld [vmem:[%s643_s1] sm:$0xff]   ;;  %v434_v1 = vld [vmem:[%s643_s1 + $0x8] sm:$0xff]   ;;  %v435_v2 = vld [vmem:[%s643_s1 + $0x10] sm:$0xff]   ;;  %19 = vst.msk [vmem:[%s645_s3] sm:$0x3] %vm18_vm2, %v446_v14  ;;  %vm238_vm3 = vcmask 64512  }
   0x2   :  { %394 = vmatprep.subr.bf16.mxu0 %v433_v0  ;;  %420 = vmatprep.subr.bf16.mxu1 %v433_v0  ;;  %v438_v3 = vld [vmem:[%s644_s0] sm:$0xff]   ;;  %v436_v4 = vld [vmem:[%s643_s1 + $0x18] sm:$0xff]   ;;  %v439_v8 = vld [vmem:[%s644_s0 + $0x8] sm:$0xff]   ;;  %vm294_vm4 = vcmask 57344  }
   0x3   :  { %395 = vmatpush3.bf16.msra.mxu0 %v433_v0  ;;  %425 = vmatpush3.bf16.msra.mxu1 %v433_v0  ;;  %v442_v5 = vld [vmem:[%s644_s0 + $0x20] sm:$0xff]   ;;  %v443_v9 = vld [vmem:[%s644_s0 + $0x28] sm:$0xff]   ;;  %v440_v10 = vld [vmem:[%s644_s0 + $0x10] sm:$0xff]  }
   0x4   :  { %396 = vmatprep.subr.bf16.mxu0 %v434_v1  ;;  %421 = vmatprep.subr.bf16.mxu1 %v434_v1  ;;  %v437_v6 = vld [vmem:[%s643_s1 + $0x20] ss:$0 sps:$4 sm:$0xff]   ;;  %v444_v11 = vld [vmem:[%s644_s0 + $0x30] sm:$0xff]   ;;  %v441_v12 = vld [vmem:[%s644_s0 + $0x18] sm:$0xff]  }
   0x5   :  { %404 = vmatprep.mubr.msk.bf16.mxu0 %vm112_vm0, %v438_v3  ;;  %412 = vmatprep.mubr.msk.bf16.mxu1 %vm112_vm0, %v442_v5  ;;  %v139_v7 = vsel %vm137_vm1, %v437_v6, 0  ;;  %v445_v13 = vld [vmem:[%s644_s0 + $0x38] sm:$0xff]  }
   0x7   :  { %397 = vmatpush3.bf16.msra.mxu0 %v434_v1  ;;  %426 = vmatpush3.bf16.msra.mxu1 %v434_v1 }
   0x8   :  { %398 = vmatprep.subr.bf16.mxu0 %v435_v2  ;;  %422 = vmatprep.subr.bf16.mxu1 %v435_v2 }
   0xb   :  { %399 = vmatpush3.bf16.msra.mxu0 %v435_v2  ;;  %427 = vmatpush3.bf16.msra.mxu1 %v435_v2 }
   0xc   :  { %400 = vmatprep.subr.bf16.mxu0 %v436_v4  ;;  %423 = vmatprep.subr.bf16.mxu1 %v436_v4 }
   0xf   :  { %401 = vmatpush3.bf16.msra.mxu0 %v436_v4  ;;  %428 = vmatpush3.bf16.msra.mxu1 %v436_v4 }
  0x10   :  { %430 = vmatprep.subr.msk.bf16.mxu0 %vm137_vm1, %v437_v6  ;;  %431 = vmatprep.subr.msk.bf16.mxu1 %vm137_vm1, %v437_v6 }
  0x13   :  { %403 = vmatpush3.bf16.msra.mxu0 %v139_v7  ;;  %429 = vmatpush3.bf16.msra.mxu1 %v139_v7 }
  0x16   :  { %405 = vmatmul.mubr.msk.bf16.vlgmr.msra.gmra.mrb[0].mxu0 %vm112_vm0, %v439_v8  ;;  %413 = vmatmul.mubr.msk.bf16.vlgmr.msra.gmra.mrb[0].mxu1 %vm112_vm0, %v443_v9 }
  0x17   :  { %408 = vmatprep.mubr.msk.bf16.mxu0 %vm112_vm0, %v440_v10  ;;  %416 = vmatprep.mubr.msk.bf16.mxu1 %vm112_vm0, %v444_v11 }
  0x1e   :  { %409 = vmatmul.mubr.msk.bf16.gmra.mrb[4].mxu0 %vm112_vm0, %v441_v12  ;;  %417 = vmatmul.mubr.msk.bf16.gmra.mrb[4].mxu1 %vm112_vm0, %v445_v13 }
  0xe9   :  { %v406_v15 = vpop.f32.mrb[0].mxu0  ;;  %v517_v16 = vpop.f32.mrb[0].mxu1 }
  0xea   :  { %241 = vst.msk [vmem:[%s646_s2 + $0x10] sm:$0xff] %vm238_vm3, %v406_v15  ;;  %v175_v17 = vpop.f32.mrb[1].mxu0  ;;  %249 = vst.msk [vmem:[%s646_s2 + $0x50] sm:$0xff] %vm238_vm3, %v517_v16  ;;  %v207_v18 = vpop.f32.mrb[1].mxu1  ;;  %v299_v24 = vmul.f32 %v406_v15, %v406_v15  ;;  %v259_v29 = vsel %vm238_vm3, %v406_v15, 0.0  ;;  %v307_v10 = vmul.f32 %v517_v16, %v517_v16  ;;  %v275_v14 = vsel %vm238_vm3, %v517_v16, 0.0 }
  0xeb   :  { %239 = vst.msk [vmem:[%s646_s2] sm:$0xff] %vm238_vm3, %v175_v17  ;;  %v297_v19 = vmul.f32 %v175_v17, %v175_v17  ;;  %v407_v20 = vpop.f32.mrb[2].mxu0  ;;  %247 = vst.msk [vmem:[%s646_s2 + $0x40] sm:$0xff] %vm238_vm3, %v207_v18  ;;  %v536_v21 = vpop.f32.mrb[2].mxu1  ;;  %v256_v25 = vsel %vm238_vm3, %v175_v17, 0.0  ;;  %v305_v61 = vmul.f32 %v207_v18, %v207_v18  ;;  %v271_v2 = vsel %vm238_vm3, %v207_v18, 0.0 }
  0xec   :  { %242 = vst.msk [vmem:[%s646_s2 + $0x18] sm:$0xff] %vm238_vm3, %v407_v20  ;;  %v178_v22 = vpop.f32.mrb[3].mxu0  ;;  %250 = vst.msk [vmem:[%s646_s2 + $0x58] sm:$0xff] %vm238_vm3, %v536_v21  ;;  %v210_v23 = vpop.f32.mrb[3].mxu1  ;;  %v300_v31 = vmul.f32 %v407_v20, %v407_v20  ;;  %v316_v35 = vsel %vm238_vm3, %v299_v24, 0.0  ;;  %v261_v36 = vsel %vm238_vm3, %v407_v20, 0.0  ;;  %v308_v15 = vmul.f32 %v536_v21, %v536_v21 }
  0xed   :  { %240 = vst.msk [vmem:[%s646_s2 + $0x8] sm:$0xff] %vm238_vm3, %v178_v22  ;;  %v257_v26 = vsel %vm238_vm3, %v178_v22, 0.0  ;;  %v298_v27 = vmul.f32 %v178_v22, %v178_v22  ;;  %248 = vst.msk [vmem:[%s646_s2 + $0x48] sm:$0xff] %vm238_vm3, %v210_v23  ;;  %v313_v30 = vsel %vm238_vm3, %v297_v19, 0.0  ;;  %v328_v6 = vsel %vm238_vm3, %v305_v61, 0.0 }
  0xee   :  { %v258_v28 = vadd.f32 %v257_v26, %v256_v25  ;;  %v318_v43 = vsel %vm238_vm3, %v300_v31, 0.0  ;;  %v306_v7 = vmul.f32 %v210_v23, %v210_v23  ;;  %v273_v11 = vsel %vm238_vm3, %v210_v23, 0.0 }
  0xef   :  { %v314_v32 = vsel %vm238_vm3, %v298_v27, 0.0  ;;  %v332_v22 = vsel %vm238_vm3, %v307_v10, 0.0  ;;  %v277_v24 = vsel %vm238_vm3, %v536_v21, 0.0  ;;  %v334_v27 = vsel %vm238_vm3, %v308_v15, 0.0 }
  0xf0   :  { %v260_v33 = vadd.f32 %v259_v29, %v258_v28  ;;  %v315_v34 = vadd.f32 %v314_v32, %v313_v30  ;;  %v330_v17 = vsel %vm238_vm3, %v306_v7, 0.0 }
  0xf1   :  { %v410_v37 = vpop.f32.mrb[4].mxu0  ;;  %v562_v38 = vpop.f32.mrb[4].mxu1 }
  0xf2   :  { %v317_v39 = vadd.f32 %v316_v35, %v315_v34  ;;  %245 = vst.msk [vmem:[%s646_s2 + $0x30] sm:$0xff] %vm238_vm3, %v410_v37  ;;  %v191_v40 = vpop.f32.mrb[5].mxu0  ;;  %v262_v41 = vadd.f32 %v261_v36, %v260_v33  ;;  %253 = vst.msk [vmem:[%s646_s2 + $0x70] sm:$0xff] %vm238_vm3, %v562_v38  ;;  %v223_v42 = vpop.f32.mrb[5].mxu1  ;;  %v303_v52 = vmul.f32 %v410_v37, %v410_v37  ;;  %v267_v58 = vsel %vm238_vm3, %v410_v37, 0.0 }
  0xf3   :  { %243 = vst.msk [vmem:[%s646_s2 + $0x20] sm:$0xff] %vm238_vm3, %v191_v40  ;;  %v263_v44 = vsel %vm238_vm3, %v191_v40, 0.0  ;;  %v301_v45 = vmul.f32 %v191_v40, %v191_v40  ;;  %v411_v46 = vpop.f32.mrb[6].mxu0  ;;  %251 = vst.msk [vmem:[%s646_s2 + $0x60] sm:$0xff] %vm238_vm3, %v223_v42  ;;  %v419_v47 = vpop.f32.mrb[6].mxu1  ;;  %v309_v18 = vmul.f32 %v223_v42, %v223_v42  ;;  %v279_v23 = vsel %vm238_vm3, %v223_v42, 0.0 }
  0xf4   :  { %v264_v48 = vadd.f32 %v263_v44, %v262_v41  ;;  %v319_v49 = vadd.f32 %v318_v43, %v317_v39  ;;  %246 = vst.msk [vmem:[%s646_s2 + $0x38] sm:$0xff] %vm238_vm3, %v411_v46  ;;  %v194_v50 = vpop.f32.mrb[7].mxu0  ;;  %254 = vst.msk [vmem:[%s646_s2 + $0x78] sm:$0xff] %vm238_vm3, %v419_v47  ;;  %v226_v51 = vpop.f32.mrb[7].mxu1  ;;  %v304_v59 = vmul.f32 %v411_v46, %v411_v46  ;;  %v324_v0 = vsel %vm238_vm3, %v303_v52, 0.0 }
  0xf5   :  { %v320_v53 = vsel %vm238_vm3, %v301_v45, 0.0  ;;  %244 = vst.msk [vmem:[%s646_s2 + $0x28] sm:$0xff] %vm238_vm3, %v194_v50  ;;  %v265_v54 = vsel %vm238_vm3, %v194_v50, 0.0  ;;  %v302_v55 = vmul.f32 %v194_v50, %v194_v50  ;;  %252 = vst.msk [vmem:[%s646_s2 + $0x68] sm:$0xff] %vm238_vm3, %v226_v51  ;;  %v269_v1 = vsel %vm238_vm3, %v411_v46, 0.0 }
  0xf6   :  { %v321_v56 = vadd.f32 %v320_v53, %v319_v49  ;;  %v266_v57 = vadd.f32 %v265_v54, %v264_v48  ;;  %v326_v5 = vsel %vm238_vm3, %v304_v59, 0.0  ;;  %v336_v16 = vsel %vm238_vm3, %v309_v18, 0.0 }
  0xf7   :  { %v322_v60 = vsel %vm238_vm3, %v302_v55, 0.0  ;;  %v310_v28 = vmul.f32 %v226_v51, %v226_v51  ;;  %v311_v31 = vmul.f32 %v562_v38, %v562_v38  ;;  %v281_v32 = vsel %vm238_vm3, %v226_v51, 0.0  ;;  %v255_v55 = vld [vmem:[%s645_s3] sm:$0x1] }
  0xf8   :  { %v268_v62 = vadd.f32 %v267_v58, %v266_v57  ;;  %v323_v63 = vadd.f32 %v322_v60, %v321_v56  ;;  %v283_v21 = vsel %vm238_vm3, %v562_v38, 0.0  ;;  %v312_v35 = vmul.f32 %v419_v47, %v419_v47  ;;  %v296_v57 = vld [vmem:[%s645_s3 + $0x1] sm:$0x1] }
  0xf9   :  { %v338_v36 = vsel %vm238_vm3, %v310_v28, 0.0  ;;  %v340_v40 = vsel %vm238_vm3, %v311_v31, 0.0  ;;  %v285_v41 = vsel %vm238_vm3, %v419_v47, 0.0 }
  0xfa   :  { %v325_v3 = vadd.f32 %v324_v0, %v323_v63  ;;  %v270_v4 = vadd.f32 %v269_v1, %v268_v62  ;;  %v342_v44 = vsel %vm238_vm3, %v312_v35, 0.0 }
  0xfc   :  { %v272_v8 = vadd.f32 %v271_v2, %v270_v4  ;;  %v327_v9 = vadd.f32 %v326_v5, %v325_v3 }
  0xfe   :  { %v329_v12 = vadd.f32 %v328_v6, %v327_v9  ;;  %v274_v13 = vadd.f32 %v273_v11, %v272_v8 }
 0x100   :  { %v276_v19 = vadd.f32 %v275_v14, %v274_v13  ;;  %v331_v20 = vadd.f32 %v330_v17, %v329_v12 }
 0x102   :  { %v333_v25 = vadd.f32 %v332_v22, %v331_v20  ;;  %v278_v26 = vadd.f32 %v277_v24, %v276_v19 }
 0x104   :  { %v280_v29 = vadd.f32 %v279_v23, %v278_v26  ;;  %v335_v30 = vadd.f32 %v334_v27, %v333_v25 }
 0x106   :  { %v337_v33 = vadd.f32 %v336_v16, %v335_v30  ;;  %v282_v34 = vadd.f32 %v281_v32, %v280_v29 }
 0x108   :  { %v284_v37 = vadd.f32 %v283_v21, %v282_v34  ;;  %v339_v39 = vadd.f32 %v338_v36, %v337_v33 }
 0x10a   :  { %v286_v42 = vadd.f32 %v285_v41, %v284_v37  ;;  %v341_v43 = vadd.f32 %v340_v40, %v339_v39 }
 0x10c   :  { %v287_v45 = vrot.slane %v286_v42, 4  ;;  %v343_v46 = vadd.f32 %v342_v44, %v341_v43 }
 0x10e   :  { %v288_v48 = vadd.f32 %v287_v45, %v286_v42  ;;  %v344_v49 = vrot.slane %v343_v46, 4 }
 0x110   :  { %v289_v50 = vrot.slane %v288_v48, 2  ;;  %v345_v51 = vadd.f32 %v344_v49, %v343_v46 }
 0x112   :  { %v290_v38 = vadd.f32 %v289_v50, %v288_v48  ;;  %v346_v52 = vrot.slane %v345_v51, 2 }
 0x114   :  { %v291_v53 = vrot.slane %v290_v38, 1  ;;  %v347_v54 = vadd.f32 %v346_v52, %v345_v51 }
 0x116   :  { %v292_v56 = vadd.f32 %v291_v53, %v290_v38  ;;  %v348_v47 = vrot.slane %v347_v54, 1 }
 0x118   :  { %v293_v58 = vadd.f32 %v292_v56, %v255_v55  ;;  %v349_v59 = vadd.f32 %v348_v47, %v347_v54 }
 0x11a   :  { %295 = vst.msk [vmem:[%s645_s3] sm:$0x1] %vm294_vm4, %v293_v58  ;;  %v350_v60 = vadd.f32 %v349_v59, %v296_v57 }
 0x11c   :  { %351 = vst.msk [vmem:[%s645_s3 + $0x1] sm:$0x1] %vm294_vm4, %v350_v60 }

// kernel: bottleneck_forward.9
= control target key start
LH: loop header
LB: loop body
LE: loop exit
PB: predicated region body
PF: predicated region fallthrough
CT: control target
= control target key end

     0   :  { %v47_v8 = vlaneseq  ;;  %vm169_vm0 = vcmask 60416   ;;  %s391_s1 = inlined_call_operand.vmem [shape: f32[2,8], index: 1, kind: input, shape index: {}]   ;;  %s392_s2 = inlined_call_operand.vmem [shape: f32[1,8], index: 2, kind: input, shape index: {}]   ;;  %s393_s0 = inlined_call_operand.vmem [shape: f32[128,8], index: 0, kind: input, shape index: {}]   ;;  %s394_s3 = inlined_call_operand.vmem [shape: f32[1,8], index: 3, kind: input, shape index: {}]   ;;  %s395_s4 = inlined_call_operand.vmem [shape: bf16[128,8], index: 4, kind: output, shape index: {}]  }
   0x1   :  { %v33_v0 = vld [vmem:[%s391_s1] sm:$0x1]  ;;  %v35_v1 = vld [vmem:[%s391_s1 + $0x1] sm:$0x1]  ;;  %v18_v16 = vld [vmem:[%s393_s0 + $0x8] sm:$0xff] }
   0x2   :  { %v34_v2 = vmul.f32 0.0078125, %v33_v0  ;;  %v36_v3 = vmul.f32 0.0078125, %v35_v1  ;;  %v48_v9 = vshrl.u32 %v47_v8, 7  ;;  %v42_v10 = vld [vmem:[%s392_s2] sm:$0x1]  ;;  %v19_v17 = vld [vmem:[%s393_s0 + $0x10] sm:$0xff] }
   0x3   :  { %v17_v13 = vld [vmem:[%s393_s0] sm:$0xff]  ;;  %v20_v18 = vld [vmem:[%s393_s0 + $0x18] sm:$0xff]  ;;  %v22_v22 = vld [vmem:[%s393_s0 + $0x28] sm:$0xff] }
   0x4   :  { %v37_v4 = vmul.f32 %v34_v2, %v34_v2  ;;  %v49_v11 = vsub.s32 0, %v48_v9  ;;  %v44_v15 = vld [vmem:[%s394_s3] sm:$0x1]  ;;  %v23_v23 = vld [vmem:[%s393_s0 + $0x30] sm:$0xff]  ;;  %v24_v24 = vld [vmem:[%s393_s0 + $0x38] sm:$0xff] }
   0x5   :  { %v21_v19 = vld [vmem:[%s393_s0 + $0x20] sm:$0xff]  ;;  %v26_v26 = vld [vmem:[%s393_s0 + $0x48] sm:$0xff]  ;;  %v27_v27 = vld [vmem:[%s393_s0 + $0x50] sm:$0xff] }
   0x6   :  { %v38_v5 = vsub.f32 %v36_v3, %v37_v4  ;;  %v25_v25 = vld [vmem:[%s393_s0 + $0x40] sm:$0xff]  ;;  %v28_v32 = vld [vmem:[%s393_s0 + $0x58] sm:$0xff]  ;;  %v30_v34 = vld [vmem:[%s393_s0 + $0x68] sm:$0xff] }
   0x7   :  { %v29_v33 = vld [vmem:[%s393_s0 + $0x60] sm:$0xff]  ;;  %v31_v3 = vld [vmem:[%s393_s0 + $0x70] sm:$0xff]  ;;  %v32_v4 = vld [vmem:[%s393_s0 + $0x78] sm:$0xff] }
   0x8   :  { %v39_v6 = vmax.f32 %v38_v5, 0.0 }
   0xa   :  { %v40_v7 = vadd.f32 1e-05, %v39_v6 }
   0xc   :  { %222 = vrsqrt.f32 %v40_v7 }
  0x16   :  { %v223_v12 = vpop.eup %222 }
  0x17   :  { %v43_v14 = vmul.f32 %v223_v12, %v42_v10 }
  0x19   :  { %v45_v20 = vmul.f32 %v43_v14, %v34_v2  ;;  %v276_v21 = vrot.slane %v43_v14, %v49_v11 }
  0x1b   :  { %v46_v28 = vsub.f32 %v44_v15, %v45_v20  ;;  %v51_v29 = vmul.f32 %v276_v21, %v17_v13  ;;  %v52_v30 = vmul.f32 %v276_v21, %v18_v16  ;;  %v53_v31 = vmul.f32 %v276_v21, %v19_v17 }
  0x1c   :  { %v54_v35 = vmul.f32 %v276_v21, %v20_v18  ;;  %v55_v36 = vmul.f32 %v276_v21, %v21_v19  ;;  %v56_v37 = vmul.f32 %v276_v21, %v22_v22  ;;  %v57_v38 = vmul.f32 %v276_v21, %v23_v23 }
  0x1d   :  { %v71_v39 = vrot.slane %v46_v28, %v49_v11  ;;  %v58_v40 = vmul.f32 %v276_v21, %v24_v24  ;;  %v59_v41 = vmul.f32 %v276_v21, %v25_v25  ;;  %v60_v42 = vmul.f32 %v276_v21, %v26_v26 }
  0x1e   :  { %v61_v43 = vmul.f32 %v276_v21, %v27_v27  ;;  %v62_v44 = vmul.f32 %v276_v21, %v28_v32  ;;  %v63_v45 = vmul.f32 %v276_v21, %v29_v33  ;;  %v64_v46 = vmul.f32 %v276_v21, %v30_v34 }
  0x1f   :  { %v73_v47 = vadd.f32 %v71_v39, %v51_v29  ;;  %v74_v48 = vadd.f32 %v71_v39, %v52_v30  ;;  %v75_v49 = vadd.f32 %v71_v39, %v53_v31  ;;  %v76_v50 = vadd.f32 %v71_v39, %v54_v35 }
  0x20   :  { %v77_v51 = vadd.f32 %v71_v39, %v55_v36  ;;  %v78_v52 = vadd.f32 %v71_v39, %v56_v37  ;;  %v79_v53 = vadd.f32 %v71_v39, %v57_v38  ;;  %v80_v54 = vadd.f32 %v71_v39, %v58_v40 }
  0x21   :  { %v89_v55 = vmax.f32 %v73_v47, 0.0  ;;  %v90_v56 = vmax.f32 %v74_v48, 0.0  ;;  %v91_v57 = vmax.f32 %v75_v49, 0.0  ;;  %v92_v58 = vmax.f32 %v76_v50, 0.0 }
  0x22   :  { %v93_v59 = vmax.f32 %v77_v51, 0.0  ;;  %v94_v60 = vmax.f32 %v78_v52, 0.0  ;;  %v95_v61 = vmax.f32 %v79_v53, 0.0  ;;  %v96_v62 = vmax.f32 %v80_v54, 0.0 }
  0x23   :  { %v206_v63 = vpack.c.bf16 %v89_v55, %v89_v55  ;;  %v207_v0 = vpack.c.bf16 %v90_v56, %v90_v56  ;;  %v208_v1 = vpack.c.bf16 %v91_v57, %v91_v57  ;;  %v209_v2 = vpack.c.bf16 %v92_v58, %v92_v58 }
  0x24   :  { %v210_v5 = vpack.c.bf16 %v93_v59, %v93_v59  ;;  %v211_v6 = vpack.c.bf16 %v94_v60, %v94_v60  ;;  %v212_v7 = vpack.c.bf16 %v95_v61, %v95_v61  ;;  %v213_v8 = vpack.c.bf16 %v96_v62, %v96_v62 }
  0x25   :  { %170 = vst.msk [vmem:[%s395_s4] sm:$0xf] %vm169_vm0, %v206_v63  ;;  %171 = vst.msk [vmem:[%s395_s4 + $0x4] sm:$0xf] %vm169_vm0, %v207_v0  ;;  %v81_v9 = vadd.f32 %v71_v39, %v59_v41  ;;  %v82_v10 = vadd.f32 %v71_v39, %v60_v42  ;;  %v83_v11 = vadd.f32 %v71_v39, %v61_v43 }
  0x26   :  { %172 = vst.msk [vmem:[%s395_s4 + $0x8] sm:$0xf] %vm169_vm0, %v208_v1  ;;  %173 = vst.msk [vmem:[%s395_s4 + $0xc] sm:$0xf] %vm169_vm0, %v209_v2  ;;  %v84_v12 = vadd.f32 %v71_v39, %v62_v44  ;;  %v85_v13 = vadd.f32 %v71_v39, %v63_v45  ;;  %v86_v14 = vadd.f32 %v71_v39, %v64_v46 }
  0x27   :  { %174 = vst.msk [vmem:[%s395_s4 + $0x10] sm:$0xf] %vm169_vm0, %v210_v5  ;;  %175 = vst.msk [vmem:[%s395_s4 + $0x14] sm:$0xf] %vm169_vm0, %v211_v6  ;;  %v65_v15 = vmul.f32 %v276_v21, %v31_v3  ;;  %v66_v16 = vmul.f32 %v276_v21, %v32_v4  ;;  %v97_v17 = vmax.f32 %v81_v9, 0.0  ;;  %v98_v18 = vmax.f32 %v82_v10, 0.0 }
  0x28   :  { %176 = vst.msk [vmem:[%s395_s4 + $0x18] sm:$0xf] %vm169_vm0, %v212_v7  ;;  %177 = vst.msk [vmem:[%s395_s4 + $0x1c] sm:$0xf] %vm169_vm0, %v213_v8  ;;  %v99_v19 = vmax.f32 %v83_v11, 0.0  ;;  %v100_v20 = vmax.f32 %v84_v12, 0.0 }
  0x29   :  { %v101_v22 = vmax.f32 %v85_v13, 0.0  ;;  %v102_v23 = vmax.f32 %v86_v14, 0.0  ;;  %v87_v24 = vadd.f32 %v71_v39, %v65_v15  ;;  %v88_v25 = vadd.f32 %v71_v39, %v66_v16 }
  0x2a   :  { %v214_v26 = vpack.c.bf16 %v97_v17, %v97_v17  ;;  %v215_v27 = vpack.c.bf16 %v98_v18, %v98_v18  ;;  %v216_v28 = vpack.c.bf16 %v99_v19, %v99_v19  ;;  %v217_v29 = vpack.c.bf16 %v100_v20, %v100_v20 }
  0x2b   :  { %v218_v30 = vpack.c.bf16 %v101_v22, %v101_v22  ;;  %v219_v31 = vpack.c.bf16 %v102_v23, %v102_v23  ;;  %v103_v32 = vmax.f32 %v87_v24, 0.0  ;;  %v104_v33 = vmax.f32 %v88_v25, 0.0 }
  0x2c   :  { %178 = vst.msk [vmem:[%s395_s4 + $0x20] sm:$0xf] %vm169_vm0, %v214_v26  ;;  %179 = vst.msk [vmem:[%s395_s4 + $0x24] sm:$0xf] %vm169_vm0, %v215_v27 }
  0x2d   :  { %180 = vst.msk [vmem:[%s395_s4 + $0x28] sm:$0xf] %vm169_vm0, %v216_v28  ;;  %181 = vst.msk [vmem:[%s395_s4 + $0x2c] sm:$0xf] %vm169_vm0, %v217_v29  ;;  %v220_v21 = vpack.c.bf16 %v103_v32, %v103_v32  ;;  %v221_v34 = vpack.c.bf16 %v104_v33, %v104_v33 }
  0x2e   :  { %182 = vst.msk [vmem:[%s395_s4 + $0x30] sm:$0xf] %vm169_vm0, %v218_v30  ;;  %183 = vst.msk [vmem:[%s395_s4 + $0x34] sm:$0xf] %vm169_vm0, %v219_v31 }
  0x2f   :  { %184 = vst.msk [vmem:[%s395_s4 + $0x38] sm:$0xf] %vm169_vm0, %v220_v21  ;;  %185 = vst.msk [vmem:[%s395_s4 + $0x3c] sm:$0xf] %vm169_vm0, %v221_v34 }

// kernel: bottleneck_forward.11
= control target key start
LH: loop header
LB: loop body
LE: loop exit
PB: predicated region body
PF: predicated region fallthrough
CT: control target
= control target key end

     0   :  { %v60_v16 = vlaneseq  ;;  %s538_s0 = inlined_call_operand.vmem [shape: f32[128,32], index: 0, kind: input, shape index: {}]   ;;  %s539_s1 = inlined_call_operand.vmem [shape: f32[2,32], index: 1, kind: input, shape index: {}]   ;;  %s540_s2 = inlined_call_operand.vmem [shape: f32[1,32], index: 2, kind: input, shape index: {}]   ;;  %s541_s3 = inlined_call_operand.vmem [shape: f32[1,32], index: 3, kind: input, shape index: {}]   ;;  %s542_s4 = inlined_call_operand.vmem [shape: f32[128,32], index: 4, kind: input, shape index: {}]   ;;  %s543_s5 = inlined_call_operand.vmem [shape: f32[2,32], index: 5, kind: input, shape index: {}]   ;;  %s544_s6 = inlined_call_operand.vmem [shape: f32[1,32], index: 6, kind: input, shape index: {}]   ;;  %s545_s7 = inlined_call_operand.vmem [shape: f32[1,32], index: 7, kind: input, shape index: {}]   ;;  %s546_s8 = inlined_call_operand.hbm [shape: f32[128,32], index: 8, kind: output, shape index: {}]  }
   0x1   :  { %v46_v0 = vld [vmem:[%s543_s5] sm:$0x1]  ;;  %v48_v1 = vld [vmem:[%s543_s5 + $0x1] sm:$0x1] }
   0x2   :  { %v47_v2 = vmul.f32 0.0078125, %v46_v0  ;;  %v49_v3 = vmul.f32 0.0078125, %v48_v1  ;;  %v118_v4 = vld [vmem:[%s539_s1] sm:$0x1]  ;;  %v120_v5 = vld [vmem:[%s539_s1 + $0x1] sm:$0x1] }
   0x3   :  { %v119_v7 = vmul.f32 0.0078125, %v118_v4  ;;  %v121_v8 = vmul.f32 0.0078125, %v120_v5 }
   0x4   :  { %v50_v6 = vmul.f32 %v47_v2, %v47_v2 }
   0x5   :  { %v122_v10 = vmul.f32 %v119_v7, %v119_v7 }
   0x6   :  { %v51_v9 = vsub.f32 %v49_v3, %v50_v6 }
   0x7   :  { %v123_v12 = vsub.f32 %v121_v8, %v122_v10 }
   0x8   :  { %v52_v11 = vmax.f32 %v51_v9, 0.0 }
   0x9   :  { %v124_v14 = vmax.f32 %v123_v12, 0.0 }
   0xa   :  { %v53_v13 = vadd.f32 1e-05, %v52_v11 }
   0xb   :  { %v125_v15 = vadd.f32 1e-05, %v124_v14 }
   0xc   :  { %242 = vrsqrt.f32 %v53_v13 }
   0xd   :  { %244 = vrsqrt.f32 %v125_v15 }
   0xe   :  { %13 = vsyncpa [#allocation3], 0  ;;  %v61_v17 = vshrl.u32 %v60_v16, 7  ;;  %v55_v18 = vld [vmem:[%s544_s6] sm:$0x1]  ;;  %v31_v27 = vld [vmem:[%s542_s4 + $0x8] sm:$0xff] }
   0xf   :  { %v127_v21 = vld [vmem:[%s540_s2] sm:$0x1]  ;;  %v32_v31 = vld [vmem:[%s542_s4 + $0x10] sm:$0xff]  ;;  %v33_v32 = vld [vmem:[%s542_s4 + $0x18] sm:$0xff]  ;;  %vm206_vm0 = vcmask 261120  }
  0x10   :  { %v62_v19 = vsub.s32 0, %v61_v17  ;;  %v30_v22 = vld [vmem:[%s542_s4] sm:$0xff]  ;;  %v103_v35 = vld [vmem:[%s538_s0 + $0x8] sm:$0xff]  ;;  %v104_v36 = vld [vmem:[%s538_s0 + $0x10] sm:$0xff] }
  0x11   :  { %v57_v25 = vld [vmem:[%s545_s7] sm:$0x1]  ;;  %v105_v41 = vld [vmem:[%s538_s0 + $0x18] sm:$0xff]  ;;  %v35_v43 = vld [vmem:[%s542_s4 + $0x28] sm:$0xff] }
  0x12   :  { %v102_v26 = vld [vmem:[%s538_s0] sm:$0xff]  ;;  %v107_v52 = vld [vmem:[%s538_s0 + $0x28] sm:$0xff]  ;;  %v36_v61 = vld [vmem:[%s542_s4 + $0x30] sm:$0xff] }
  0x13   :  { %v34_v33 = vld [vmem:[%s542_s4 + $0x20] sm:$0xff]  ;;  %v108_v62 = vld [vmem:[%s538_s0 + $0x30] sm:$0xff]  ;;  %v37_v15 = vld [vmem:[%s542_s4 + $0x38] sm:$0xff] }
  0x14   :  { %v129_v34 = vld [vmem:[%s541_s3] sm:$0x1]  ;;  %v109_v16 = vld [vmem:[%s538_s0 + $0x38] sm:$0xff] }
  0x15   :  { %v106_v42 = vld [vmem:[%s538_s0 + $0x20] sm:$0xff] }
  0x16   :  { %v243_v20 = vpop.eup %242 }
  0x17   :  { %v56_v23 = vmul.f32 %v243_v20, %v55_v18  ;;  %v245_v24 = vpop.eup %244 }
  0x18   :  { %v128_v30 = vmul.f32 %v245_v24, %v127_v21  ;;  %v38_v21 = vld [vmem:[%s542_s4 + $0x40] sm:$0xff] }
  0x19   :  { %v58_v28 = vmul.f32 %v56_v23, %v47_v2  ;;  %v348_v29 = vrot.slane %v56_v23, %v62_v19  ;;  %v39_v23 = vld [vmem:[%s542_s4 + $0x48] sm:$0xff] }
  0x1a   :  { %v130_v39 = vmul.f32 %v128_v30, %v119_v7  ;;  %v369_v40 = vrot.slane %v128_v30, %v62_v19  ;;  %v40_v30 = vld [vmem:[%s542_s4 + $0x50] sm:$0xff] }
  0x1b   :  { %v59_v37 = vsub.f32 %v57_v25, %v58_v28  ;;  %v64_v38 = vmul.f32 %v348_v29, %v30_v22  ;;  %v65_v44 = vmul.f32 %v348_v29, %v31_v27  ;;  %v66_v45 = vmul.f32 %v348_v29, %v32_v31  ;;  %v110_v22 = vld [vmem:[%s538_s0 + $0x40] sm:$0xff]  ;;  %v111_v28 = vld [vmem:[%s538_s0 + $0x48] sm:$0xff] }
  0x1c   :  { %v67_v46 = vmul.f32 %v348_v29, %v33_v32  ;;  %v68_v47 = vmul.f32 %v348_v29, %v34_v33  ;;  %v131_v49 = vsub.f32 %v129_v34, %v130_v39  ;;  %v136_v50 = vmul.f32 %v369_v40, %v102_v26  ;;  %v112_v39 = vld [vmem:[%s538_s0 + $0x50] sm:$0xff] }
  0x1d   :  { %v384_v48 = vrot.slane %v59_v37, %v62_v19  ;;  %v137_v51 = vmul.f32 %v369_v40, %v103_v35  ;;  %v138_v53 = vmul.f32 %v369_v40, %v104_v36  ;;  %v139_v54 = vmul.f32 %v369_v40, %v105_v41  ;;  %v41_v41 = vld [vmem:[%s542_s4 + $0x58] sm:$0xff] }
  0x1e   :  { %v140_v55 = vmul.f32 %v369_v40, %v106_v42  ;;  %v69_v56 = vmul.f32 %v348_v29, %v35_v43  ;;  %v396_v58 = vrot.slane %v131_v49, %v62_v19  ;;  %v141_v2 = vmul.f32 %v369_v40, %v107_v52 }
  0x1f   :  { %v86_v57 = vadd.f32 %v384_v48, %v64_v38  ;;  %v87_v59 = vadd.f32 %v384_v48, %v65_v44  ;;  %v88_v60 = vadd.f32 %v384_v48, %v66_v45  ;;  %v89_v63 = vadd.f32 %v384_v48, %v67_v46  ;;  %v113_v46 = vld [vmem:[%s538_s0 + $0x58] sm:$0xff] }
  0x20   :  { %v90_v0 = vadd.f32 %v384_v48, %v68_v47  ;;  %v91_v1 = vadd.f32 %v384_v48, %v69_v56  ;;  %v158_v3 = vadd.f32 %v396_v58, %v136_v50  ;;  %v159_v4 = vadd.f32 %v396_v58, %v137_v51  ;;  %v42_v47 = vld [vmem:[%s542_s4 + $0x60] sm:$0xff] }
  0x21   :  { %v160_v5 = vadd.f32 %v396_v58, %v138_v53  ;;  %v161_v6 = vadd.f32 %v396_v58, %v139_v54  ;;  %v162_v7 = vadd.f32 %v396_v58, %v140_v55  ;;  %v163_v8 = vadd.f32 %v396_v58, %v141_v2  ;;  %v114_v53 = vld [vmem:[%s538_s0 + $0x60] sm:$0xff] }
  0x22   :  { %v70_v9 = vmul.f32 %v348_v29, %v36_v61  ;;  %v142_v10 = vmul.f32 %v369_v40, %v108_v62  ;;  %v174_v11 = vadd.f32 %v158_v3, %v86_v57  ;;  %v175_v12 = vadd.f32 %v159_v4, %v87_v59  ;;  %v115_v4 = vld [vmem:[%s538_s0 + $0x68] sm:$0xff] }
  0x23   :  { %v176_v13 = vadd.f32 %v160_v5, %v88_v60  ;;  %v177_v14 = vadd.f32 %v161_v6, %v89_v63  ;;  %v178_v17 = vadd.f32 %v162_v7, %v90_v0  ;;  %v179_v18 = vadd.f32 %v163_v8, %v91_v1  ;;  %v43_v63 = vld [vmem:[%s542_s4 + $0x68] sm:$0xff]  ;;  %v44_v5 = vld [vmem:[%s542_s4 + $0x70] sm:$0xff] }
  0x24   :  { %v92_v19 = vadd.f32 %v384_v48, %v70_v9  ;;  %v164_v20 = vadd.f32 %v396_v58, %v142_v10  ;;  %v190_v24 = vmax.f32 %v174_v11, 0.0  ;;  %v191_v25 = vmax.f32 %v175_v12, 0.0  ;;  %v116_v6 = vld [vmem:[%s538_s0 + $0x70] sm:$0xff]  ;;  %v45_v11 = vld [vmem:[%s542_s4 + $0x78] sm:$0xff] }
  0x25   :  { %v192_v26 = vmax.f32 %v176_v13, 0.0  ;;  %v193_v27 = vmax.f32 %v177_v14, 0.0  ;;  %v194_v31 = vmax.f32 %v178_v17, 0.0  ;;  %v195_v32 = vmax.f32 %v179_v18, 0.0 }
  0x26   :  { %v180_v33 = vadd.f32 %v164_v20, %v92_v19  ;;  %v71_v34 = vmul.f32 %v348_v29, %v37_v15  ;;  %207 = vst.msk [vmem:[#allocation2] sm:$0xff] %vm206_vm0, %v190_v24  ;;  %208 = vst.msk [vmem:[#allocation2 + $0x8] sm:$0xff] %vm206_vm0, %v191_v25  ;;  %v143_v35 = vmul.f32 %v369_v40, %v109_v16  ;;  %v117_v20 = vld [vmem:[%s538_s0 + $0x78] sm:$0xff]  ;;  %s270_s0 = smov [#allocation2]  }
  0x27   :  { %209 = vst.msk [vmem:[#allocation2 + $0x10] sm:$0xff] %vm206_vm0, %v192_v26  ;;  %210 = vst.msk [vmem:[#allocation2 + $0x18] sm:$0xff] %vm206_vm0, %v193_v27  ;;  %v72_v36 = vmul.f32 %v348_v29, %v38_v21  ;;  %v144_v37 = vmul.f32 %v369_v40, %v110_v22  ;;  %v73_v38 = vmul.f32 %v348_v29, %v39_v23  ;;  %s228_s4 = sshll.u32 %s270_s0, 4  ;;  %s229_s4 = int_to_ptr.vmem [resolvable:$true] %s228_s4 }
  0x28   :  { %211 = vst.msk [vmem:[#allocation2 + $0x20] sm:$0xff] %vm206_vm0, %v194_v31  ;;  %212 = vst.msk [vmem:[#allocation2 + $0x28] sm:$0xff] %vm206_vm0, %v195_v32  ;;  %v196_v42 = vmax.f32 %v180_v33, 0.0  ;;  %v93_v43 = vadd.f32 %v384_v48, %v71_v34  ;;  %v145_v44 = vmul.f32 %v369_v40, %v111_v28  ;;  %v74_v45 = vmul.f32 %v348_v29, %v40_v30  ;;  %s246_s7 = scalar_lea.vmem %s229_s4, 2048  ;;  %p251_p1 = scmp.lt.s32.totalorder %s229_s4, %s229_s4 }
  0x29   :  { %v165_v49 = vadd.f32 %v396_v58, %v143_v35  ;;  %v94_v50 = vadd.f32 %v384_v48, %v72_v36  ;;  %v166_v51 = vadd.f32 %v396_v58, %v144_v37  ;;  %v95_v52 = vadd.f32 %v384_v48, %v73_v38  ;;  %p247_p0 = scmp.ne.s32.totalorder %s229_s4, %s246_s7  ;;  %p252_p2 = scmp.lt.s32.totalorder %s246_s7, %s246_s7 }
  0x2a   :  { %213 = vst.msk [vmem:[#allocation2 + $0x30] sm:$0xff] %vm206_vm0, %v196_v42  ;;  %v167_v54 = vadd.f32 %v396_v58, %v145_v44  ;;  %v96_v55 = vadd.f32 %v384_v48, %v74_v45  ;;  %v146_v56 = vmul.f32 %v369_v40, %v112_v39  ;;  %v75_v57 = vmul.f32 %v348_v29, %v41_v41 }
  0x2b   :  { %v181_v59 = vadd.f32 %v165_v49, %v93_v43  ;;  %v182_v60 = vadd.f32 %v166_v51, %v94_v50  ;;  %v147_v61 = vmul.f32 %v369_v40, %v113_v46  ;;  %v76_v62 = vmul.f32 %v348_v29, %v42_v47  ;;  %p253_p3 = por %p252_p2, %p251_p1 }
  0x2c   :  { %v183_v0 = vadd.f32 %v167_v54, %v95_v52  ;;  %v168_v1 = vadd.f32 %v396_v58, %v146_v56  ;;  %v97_v2 = vadd.f32 %v384_v48, %v75_v57  ;;  %v148_v3 = vmul.f32 %v369_v40, %v114_v53 }
  0x2d   :  { %v197_v7 = vmax.f32 %v181_v59, 0.0  ;;  %v198_v8 = vmax.f32 %v182_v60, 0.0  ;;  %v169_v9 = vadd.f32 %v396_v58, %v147_v61  ;;  %v98_v10 = vadd.f32 %v384_v48, %v76_v62  ;;  %p254_p4 = pnand %p253_p3, %p247_p0 }
  0x2e   :  { %v199_v12 = vmax.f32 %v183_v0, 0.0  ;;  %v184_v13 = vadd.f32 %v168_v1, %v96_v55  ;;  %v170_v14 = vadd.f32 %v396_v58, %v148_v3  ;;  %v77_v15 = vmul.f32 %v348_v29, %v43_v63 }
  0x2f   :  { %214 = vst.msk [vmem:[#allocation2 + $0x38] sm:$0xff] %vm206_vm0, %v197_v7  ;;  %215 = vst.msk [vmem:[#allocation2 + $0x40] sm:$0xff] %vm206_vm0, %v198_v8  ;;  %v185_v16 = vadd.f32 %v169_v9, %v97_v2  ;;  %v149_v17 = vmul.f32 %v369_v40, %v115_v4  ;;  %v78_v18 = vmul.f32 %v348_v29, %v44_v5 }
  0x30   :  { %v150_v19 = vmul.f32 %v369_v40, %v116_v6  ;;  %216 = vst.msk [vmem:[#allocation2 + $0x48] sm:$0xff] %vm206_vm0, %v199_v12  ;;  %v200_v21 = vmax.f32 %v184_v13, 0.0  ;;  %v186_v22 = vadd.f32 %v170_v14, %v98_v10  ;;  %v99_v23 = vadd.f32 %v384_v48, %v77_v15 }
  0x31   :  { %v79_v24 = vmul.f32 %v348_v29, %v45_v11  ;;  %v201_v25 = vmax.f32 %v185_v16, 0.0  ;;  %v171_v26 = vadd.f32 %v396_v58, %v149_v17  ;;  %v100_v27 = vadd.f32 %v384_v48, %v78_v18 }
  0x32   :  { %v172_v28 = vadd.f32 %v396_v58, %v150_v19  ;;  %217 = vst.msk [vmem:[#allocation2 + $0x50] sm:$0xff] %vm206_vm0, %v200_v21  ;;  %v202_v30 = vmax.f32 %v186_v22, 0.0  ;;  %v151_v32 = vmul.f32 %v369_v40, %v117_v20 }
  0x33   :  { %v101_v31 = vadd.f32 %v384_v48, %v79_v24  ;;  %218 = vst.msk [vmem:[#allocation2 + $0x58] sm:$0xff] %vm206_vm0, %v201_v25  ;;  %v187_v33 = vadd.f32 %v171_v26, %v99_v23 }
  0x34   :  { %v188_v34 = vadd.f32 %v172_v28, %v100_v27  ;;  %219 = vst.msk [vmem:[#allocation2 + $0x60] sm:$0xff] %vm206_vm0, %v202_v30  ;;  %v173_v29 = vadd.f32 %v396_v58, %v151_v32 }
  0x35   :  { %v203_v35 = vmax.f32 %v187_v33, 0.0 }
  0x36   :  { %v204_v36 = vmax.f32 %v188_v34, 0.0  ;;  %v189_v37 = vadd.f32 %v173_v29, %v101_v31 }
  0x37   :  { %220 = vst.msk [vmem:[#allocation2 + $0x68] sm:$0xff] %vm206_vm0, %v203_v35 }
  0x38   :  { %221 = vst.msk [vmem:[#allocation2 + $0x70] sm:$0xff] %vm206_vm0, %v204_v36  ;;  %v205_v48 = vmax.f32 %v189_v37, 0.0 }
  0x3a   :  { %222 = vst.msk [vmem:[#allocation2 + $0x78] sm:$0xff] %vm206_vm0, %v205_v48 }
  0x3b   :  { %257 = shalt.err (!%p254_p4)
}
  0x3c   :  { %s258_s27 = scalar_lea.hbm %s546_s8, 2048 }
  0x3d   :  { %p259_p5 = scmp.ne.s32.totalorder %s546_s8, %s258_s27  ;;  %p262_p6 = scmp.lt.u32.totalorder %s258_s27, %s546_s8 }
  0x3f   :  { %p264_p7 = pnand %p262_p6, %p259_p5 }
  0x41   :  { %267 = shalt.err (!%p264_p7)
}
  0x42   :  { %s271_s10 = smov 128   ;;  %s272_s11 = smov 8  }
  0x43   :  { %234 = dma.vmem_to_hbm [thread:$0]  %s229_s4, 2048, %s546_s8, [#allocation3], %s271_s10, %s271_s10, %s272_s11  }
  0x44   :  { %268 = dma.done.wait [#allocation3], 2048  }
  0x45   :  { %269 = vsyncadd [#allocation3], 4294965248 }
  0x46   :  { %238 = vsyncpa [#allocation3], 1 }

// kernel: bottleneck_forward.10
= control target key start
LH: loop header
LB: loop body
LE: loop exit
PB: predicated region body
PF: predicated region fallthrough
CT: control target
= control target key end

     0   :  { %vm111_vm0 = vcmask 1043456   ;;  %vm86_vm1 = vcmask 64512   ;;  %vm276_vm2 = vcmask 130048   ;;  %vm26_vm3 = vcmask 254976   ;;  %s1089_s1 = inlined_call_operand.vmem [shape: bf16[8,32], index: 1, kind: input, shape index: {}]   ;;  %s1090_s3 = inlined_call_operand.vmem [shape: bf16[16,32], index: 3, kind: input, shape index: {}]   ;;  %s1091_s0 = inlined_call_operand.vmem [shape: bf16[128,8], index: 0, kind: input, shape index: {}]   ;;  %s1092_s2 = inlined_call_operand.vmem [shape: bf16[128,16], index: 2, kind: input, shape index: {}]   ;;  %s1093_s6 = inlined_call_operand.vmem [shape: f32[2,32], index: 6, kind: output, shape index: {2}]   ;;  %s1094_s7 = inlined_call_operand.vmem [shape: f32[2,32], index: 7, kind: output, shape index: {3}]   ;;  %s1095_s4 = inlined_call_operand.vmem [shape: f32[128,32], index: 4, kind: output, shape index: {0}]   ;;  %s1096_s5 = inlined_call_operand.vmem [shape: f32[128,32], index: 5, kind: output, shape index: {1}]  }
   0x1   :  { %v45_v0 = vld [vmem:[%s1089_s1] sm:$0xf]  ;;  %v731_v4 = vld [vmem:[%s1091_s0 + $0x8] sm:$0xff]   ;;  %v734_v7 = vld [vmem:[%s1091_s0 + $0x10] sm:$0xff]   ;;  %v746_v19 = vmov 0.0   ;;  %vm398_vm4 = vcmask 261120  }
   0x2   :  { %727 = vmatprep.subr.msk.bf16.mxu0 %vm111_vm0, %v45_v0  ;;  %v113_v1 = vsel %vm111_vm0, %v45_v0, 0  ;;  %v729_v2 = vld [vmem:[%s1090_s3] sm:$0xff]   ;;  %v733_v6 = vld [vmem:[%s1092_s2 + $0x8] sm:$0xff]   ;;  %v736_v8 = vld [vmem:[%s1092_s2 + $0x10] sm:$0xff]   ;;  %27 = vst.msk [vmem:[%s1093_s6] sm:$0x3] %vm26_vm3, %v746_v19 }
   0x3   :  { %692 = vmatpush3.bf16.msra.mxu0 %v113_v1  ;;  %v730_v3 = vld [vmem:[%s1091_s0] sm:$0xff]   ;;  %709 = vmatprep.subr.bf16.mxu1 %v729_v2  ;;  %v735_v9 = vld [vmem:[%s1091_s0 + $0x18] sm:$0xff]   ;;  %v739_v13 = vld [vmem:[%s1091_s0 + $0x28] sm:$0xff]   ;;  %28 = vst.msk [vmem:[%s1094_s7] sm:$0x3] %vm26_vm3, %v746_v19  ;;  %vm470_vm5 = vcmask 253952  }
   0x4   :  { %693 = vmatprep.mubr.msk.bf16.mxu0 %vm86_vm1, %v730_v3  ;;  %710 = vmatpush3.bf16.msra.mxu1 %v729_v2  ;;  %v732_v5 = vld [vmem:[%s1092_s2] sm:$0xff]   ;;  %v737_v11 = vld [vmem:[%s1092_s2 + $0x18] sm:$0xff]   ;;  %v742_v14 = vld [vmem:[%s1091_s0 + $0x30] sm:$0xff]  }
   0x5   :  { %711 = vmatprep.mubr.msk.bf16.mxu1 %vm276_vm2, %v732_v5  ;;  %v738_v10 = vld [vmem:[%s1091_s0 + $0x20] sm:$0xff]   ;;  %v741_v15 = vld [vmem:[%s1092_s2 + $0x28] sm:$0xff]   ;;  %v744_v16 = vld [vmem:[%s1092_s2 + $0x30] sm:$0xff]  }
   0x6   :  { %694 = vmatmul.mubr.msk.bf16.vlgmr.msra.gmra.mrb[0].mxu0 %vm86_vm1, %v731_v4  ;;  %v740_v12 = vld [vmem:[%s1092_s2 + $0x20] sm:$0xff]   ;;  %v743_v17 = vld [vmem:[%s1091_s0 + $0x38] sm:$0xff]  }
   0x7   :  { %712 = vmatmul.mubr.msk.bf16.vlgmr.msra.gmra.mrb[0].mxu1 %vm276_vm2, %v733_v6  ;;  %697 = vmatprep.mubr.msk.bf16.mxu0 %vm86_vm1, %v734_v7  ;;  %v745_v18 = vld [vmem:[%s1092_s2 + $0x38] sm:$0xff]  }
   0x8   :  { %715 = vmatprep.mubr.msk.bf16.mxu1 %vm276_vm2, %v736_v8 }
   0xe   :  { %698 = vmatmul.mubr.msk.bf16.gmra.mrb[4].mxu0 %vm86_vm1, %v735_v9 }
   0xf   :  { %701 = vmatprep.mubr.msk.bf16.mxu0 %vm86_vm1, %v738_v10  ;;  %716 = vmatmul.mubr.msk.bf16.gmra.mrb[4].mxu1 %vm276_vm2, %v737_v11 }
  0x10   :  { %719 = vmatprep.mubr.msk.bf16.mxu1 %vm276_vm2, %v740_v12 }
  0x16   :  { %702 = vmatmul.mubr.msk.bf16.gmra.mrb[8].mxu0 %vm86_vm1, %v739_v13 }
  0x17   :  { %705 = vmatprep.mubr.msk.bf16.mxu0 %vm86_vm1, %v742_v14  ;;  %720 = vmatmul.mubr.msk.bf16.gmra.mrb[8].mxu1 %vm276_vm2, %v741_v15 }
  0x18   :  { %723 = vmatprep.mubr.msk.bf16.mxu1 %vm276_vm2, %v744_v16 }
  0x1e   :  { %706 = vmatmul.mubr.msk.bf16.gmra.mrb[12].mxu0 %vm86_vm1, %v743_v17 }
  0x1f   :  { %724 = vmatmul.mubr.msk.bf16.gmra.mrb[12].mxu1 %vm276_vm2, %v745_v18 }
  0xd9   :  { %v695_v20 = vpop.f32.mrb[0].mxu0 }
  0xda   :  { %401 = vst.msk [vmem:[%s1095_s4 + $0x10] sm:$0xff] %vm398_vm4, %v695_v20  ;;  %v475_v21 = vmul.f32 %v695_v20, %v695_v20  ;;  %v149_v22 = vpop.f32.mrb[1].mxu0  ;;  %v713_v25 = vpop.f32.mrb[0].mxu1  ;;  %v435_v26 = vsel %vm398_vm4, %v695_v20, 0.0 }
  0xdb   :  { %399 = vst.msk [vmem:[%s1095_s4] sm:$0xff] %vm398_vm4, %v149_v22  ;;  %v473_v23 = vmul.f32 %v149_v22, %v149_v22  ;;  %v696_v24 = vpop.f32.mrb[2].mxu0  ;;  %417 = vst.msk [vmem:[%s1096_s5 + $0x10] sm:$0xff] %vm398_vm4, %v713_v25  ;;  %v335_v28 = vpop.f32.mrb[1].mxu1  ;;  %v432_v29 = vsel %vm398_vm4, %v149_v22, 0.0  ;;  %v532_v40 = vsel %vm398_vm4, %v713_v25, 0.0  ;;  %v571_v41 = vmul.f32 %v713_v25, %v713_v25 }
  0xdc   :  { %402 = vst.msk [vmem:[%s1095_s4 + $0x18] sm:$0xff] %vm398_vm4, %v696_v24  ;;  %v152_v27 = vpop.f32.mrb[3].mxu0  ;;  %v476_v30 = vmul.f32 %v696_v24, %v696_v24  ;;  %415 = vst.msk [vmem:[%s1096_s5] sm:$0xff] %vm398_vm4, %v335_v28  ;;  %v714_v33 = vpop.f32.mrb[2].mxu1  ;;  %v492_v34 = vsel %vm398_vm4, %v475_v21, 0.0  ;;  %v437_v35 = vsel %vm398_vm4, %v696_v24, 0.0  ;;  %v569_v37 = vmul.f32 %v335_v28, %v335_v28 }
  0xdd   :  { %400 = vst.msk [vmem:[%s1095_s4 + $0x8] sm:$0xff] %vm398_vm4, %v152_v27  ;;  %v433_v31 = vsel %vm398_vm4, %v152_v27, 0.0  ;;  %v474_v32 = vmul.f32 %v152_v27, %v152_v27  ;;  %418 = vst.msk [vmem:[%s1096_s5 + $0x18] sm:$0xff] %vm398_vm4, %v714_v33  ;;  %v338_v38 = vpop.f32.mrb[3].mxu1  ;;  %v489_v39 = vsel %vm398_vm4, %v473_v23, 0.0  ;;  %v529_v45 = vsel %vm398_vm4, %v335_v28, 0.0 }
  0xde   :  { %v434_v36 = vadd.f32 %v433_v31, %v432_v29  ;;  %416 = vst.msk [vmem:[%s1096_s5 + $0x8] sm:$0xff] %vm398_vm4, %v338_v38  ;;  %v530_v46 = vsel %vm398_vm4, %v338_v38, 0.0  ;;  %v494_v47 = vsel %vm398_vm4, %v476_v30, 0.0  ;;  %v572_v48 = vmul.f32 %v714_v33, %v714_v33 }
  0xdf   :  { %v490_v42 = vsel %vm398_vm4, %v474_v32, 0.0  ;;  %v531_v49 = vadd.f32 %v530_v46, %v529_v45  ;;  %v570_v50 = vmul.f32 %v338_v38, %v338_v38  ;;  %v585_v53 = vsel %vm398_vm4, %v569_v37, 0.0 }
  0xe0   :  { %v436_v43 = vadd.f32 %v435_v26, %v434_v36  ;;  %v491_v44 = vadd.f32 %v490_v42, %v489_v39  ;;  %v588_v63 = vsel %vm398_vm4, %v571_v41, 0.0  ;;  %v534_v5 = vsel %vm398_vm4, %v714_v33, 0.0 }
  0xe1   :  { %v699_v51 = vpop.f32.mrb[4].mxu0  ;;  %v533_v57 = vadd.f32 %v532_v40, %v531_v49  ;;  %v586_v58 = vsel %vm398_vm4, %v570_v50, 0.0  ;;  %v590_v6 = vsel %vm398_vm4, %v572_v48, 0.0 }
  0xe2   :  { %v493_v52 = vadd.f32 %v492_v34, %v491_v44  ;;  %405 = vst.msk [vmem:[%s1095_s4 + $0x30] sm:$0xff] %vm398_vm4, %v699_v51  ;;  %v479_v54 = vmul.f32 %v699_v51, %v699_v51  ;;  %v165_v55 = vpop.f32.mrb[5].mxu0  ;;  %v438_v56 = vadd.f32 %v437_v35, %v436_v43  ;;  %v717_v62 = vpop.f32.mrb[4].mxu1  ;;  %v587_v0 = vadd.f32 %v586_v58, %v585_v53 }
  0xe3   :  { %403 = vst.msk [vmem:[%s1095_s4 + $0x20] sm:$0xff] %vm398_vm4, %v165_v55  ;;  %v439_v59 = vsel %vm398_vm4, %v165_v55, 0.0  ;;  %v477_v60 = vmul.f32 %v165_v55, %v165_v55  ;;  %v700_v61 = vpop.f32.mrb[6].mxu0  ;;  %421 = vst.msk [vmem:[%s1096_s5 + $0x30] sm:$0xff] %vm398_vm4, %v717_v62  ;;  %v351_v4 = vpop.f32.mrb[5].mxu1  ;;  %v443_v7 = vsel %vm398_vm4, %v699_v51, 0.0  ;;  %v535_v18 = vadd.f32 %v534_v5, %v533_v57 }
  0xe4   :  { %v440_v1 = vadd.f32 %v439_v59, %v438_v56  ;;  %v495_v2 = vadd.f32 %v494_v47, %v493_v52  ;;  %406 = vst.msk [vmem:[%s1095_s4 + $0x38] sm:$0xff] %vm398_vm4, %v700_v61  ;;  %v168_v3 = vpop.f32.mrb[7].mxu0  ;;  %419 = vst.msk [vmem:[%s1096_s5 + $0x20] sm:$0xff] %vm398_vm4, %v351_v4  ;;  %v718_v9 = vpop.f32.mrb[6].mxu1  ;;  %v589_v10 = vadd.f32 %v588_v63, %v587_v0  ;;  %v500_v11 = vsel %vm398_vm4, %v479_v54, 0.0 }
  0xe5   :  { %v496_v8 = vsel %vm398_vm4, %v477_v60, 0.0  ;;  %404 = vst.msk [vmem:[%s1095_s4 + $0x28] sm:$0xff] %vm398_vm4, %v168_v3  ;;  %v441_v13 = vsel %vm398_vm4, %v168_v3, 0.0  ;;  %422 = vst.msk [vmem:[%s1096_s5 + $0x38] sm:$0xff] %vm398_vm4, %v718_v9  ;;  %v354_v14 = vpop.f32.mrb[7].mxu1  ;;  %v445_v15 = vsel %vm398_vm4, %v700_v61, 0.0  ;;  %v478_v17 = vmul.f32 %v168_v3, %v168_v3 }
  0xe6   :  { %v497_v12 = vadd.f32 %v496_v8, %v495_v2  ;;  %v442_v16 = vadd.f32 %v441_v13, %v440_v1  ;;  %420 = vst.msk [vmem:[%s1096_s5 + $0x28] sm:$0xff] %vm398_vm4, %v354_v14  ;;  %v480_v19 = vmul.f32 %v700_v61, %v700_v61  ;;  %v536_v20 = vsel %vm398_vm4, %v351_v4, 0.0 }
  0xe7   :  { %v573_v21 = vmul.f32 %v351_v4, %v351_v4  ;;  %v591_v22 = vadd.f32 %v590_v6, %v589_v10  ;;  %v540_v23 = vsel %vm398_vm4, %v717_v62, 0.0  ;;  %v498_v25 = vsel %vm398_vm4, %v478_v17, 0.0 }
  0xe8   :  { %v444_v24 = vadd.f32 %v443_v7, %v442_v16  ;;  %v537_v26 = vadd.f32 %v536_v20, %v535_v18  ;;  %v575_v28 = vmul.f32 %v717_v62, %v717_v62  ;;  %v499_v29 = vadd.f32 %v498_v25, %v497_v12 }
  0xe9   :  { %v703_v27 = vpop.f32.mrb[8].mxu0  ;;  %v592_v30 = vsel %vm398_vm4, %v573_v21, 0.0  ;;  %v538_v31 = vsel %vm398_vm4, %v354_v14, 0.0  ;;  %v576_v34 = vmul.f32 %v718_v9, %v718_v9  ;;  %v574_v36 = vmul.f32 %v354_v14, %v354_v14 }
  0xea   :  { %409 = vst.msk [vmem:[%s1095_s4 + $0x50] sm:$0xff] %vm398_vm4, %v703_v27  ;;  %v181_v32 = vpop.f32.mrb[9].mxu0  ;;  %v593_v33 = vadd.f32 %v592_v30, %v591_v22  ;;  %v539_v35 = vadd.f32 %v538_v31, %v537_v26  ;;  %v721_v38 = vpop.f32.mrb[8].mxu1  ;;  %v502_v39 = vsel %vm398_vm4, %v480_v19, 0.0  ;;  %v501_v40 = vadd.f32 %v500_v11, %v499_v29 }
  0xeb   :  { %407 = vst.msk [vmem:[%s1095_s4 + $0x40] sm:$0xff] %vm398_vm4, %v181_v32  ;;  %v704_v37 = vpop.f32.mrb[10].mxu0  ;;  %v483_v41 = vmul.f32 %v703_v27, %v703_v27  ;;  %v446_v42 = vadd.f32 %v445_v15, %v444_v24  ;;  %425 = vst.msk [vmem:[%s1096_s5 + $0x50] sm:$0xff] %vm398_vm4, %v721_v38  ;;  %v367_v44 = vpop.f32.mrb[9].mxu1  ;;  %v594_v46 = vsel %vm398_vm4, %v574_v36, 0.0  ;;  %v447_v47 = vsel %vm398_vm4, %v181_v32, 0.0 }
  0xec   :  { %410 = vst.msk [vmem:[%s1095_s4 + $0x58] sm:$0xff] %vm398_vm4, %v704_v37  ;;  %v184_v43 = vpop.f32.mrb[11].mxu0  ;;  %v541_v45 = vadd.f32 %v540_v23, %v539_v35  ;;  %v481_v48 = vmul.f32 %v181_v32, %v181_v32  ;;  %423 = vst.msk [vmem:[%s1096_s5 + $0x40] sm:$0xff] %vm398_vm4, %v367_v44  ;;  %v981_v49 = vpop.f32.mrb[10].mxu1  ;;  %v596_v50 = vsel %vm398_vm4, %v575_v28, 0.0  ;;  %v595_v51 = vadd.f32 %v594_v46, %v593_v33 }
  0xed   :  { %408 = vst.msk [vmem:[%s1095_s4 + $0x48] sm:$0xff] %vm398_vm4, %v184_v43  ;;  %v448_v52 = vadd.f32 %v447_v47, %v446_v42  ;;  %v503_v53 = vadd.f32 %v502_v39, %v501_v40  ;;  %426 = vst.msk [vmem:[%s1096_s5 + $0x58] sm:$0xff] %vm398_vm4, %v981_v49  ;;  %v370_v54 = vpop.f32.mrb[11].mxu1  ;;  %v542_v55 = vsel %vm398_vm4, %v718_v9, 0.0  ;;  %v598_v56 = vsel %vm398_vm4, %v576_v34, 0.0 }
  0xee   :  { %v451_v57 = vsel %vm398_vm4, %v703_v27, 0.0  ;;  %v504_v58 = vsel %vm398_vm4, %v481_v48, 0.0  ;;  %424 = vst.msk [vmem:[%s1096_s5 + $0x48] sm:$0xff] %vm398_vm4, %v370_v54  ;;  %v597_v59 = vadd.f32 %v596_v50, %v595_v51  ;;  %v508_v60 = vsel %vm398_vm4, %v483_v41, 0.0 }
  0xef   :  { %v505_v61 = vadd.f32 %v504_v58, %v503_v53  ;;  %v449_v62 = vsel %vm398_vm4, %v184_v43, 0.0  ;;  %v484_v63 = vmul.f32 %v704_v37, %v704_v37  ;;  %v482_v1 = vmul.f32 %v184_v43, %v184_v43 }
  0xf0   :  { %v450_v0 = vadd.f32 %v449_v62, %v448_v52  ;;  %v543_v2 = vadd.f32 %v542_v55, %v541_v45  ;;  %v453_v4 = vsel %vm398_vm4, %v704_v37, 0.0  ;;  %v544_v5 = vsel %vm398_vm4, %v367_v44, 0.0 }
  0xf1   :  { %v707_v3 = vpop.f32.mrb[12].mxu0  ;;  %v577_v6 = vmul.f32 %v367_v44, %v367_v44  ;;  %v599_v7 = vadd.f32 %v598_v56, %v597_v59  ;;  %v548_v9 = vsel %vm398_vm4, %v721_v38, 0.0  ;;  %v506_v11 = vsel %vm398_vm4, %v482_v1, 0.0 }
  0xf2   :  { %413 = vst.msk [vmem:[%s1095_s4 + $0x70] sm:$0xff] %vm398_vm4, %v707_v3  ;;  %v197_v8 = vpop.f32.mrb[13].mxu0  ;;  %v452_v10 = vadd.f32 %v451_v57, %v450_v0  ;;  %v545_v12 = vadd.f32 %v544_v5, %v543_v2  ;;  %v725_v14 = vpop.f32.mrb[12].mxu1  ;;  %v579_v15 = vmul.f32 %v721_v38, %v721_v38  ;;  %v507_v16 = vadd.f32 %v506_v11, %v505_v61 }
  0xf3   :  { %411 = vst.msk [vmem:[%s1095_s4 + $0x60] sm:$0xff] %vm398_vm4, %v197_v8  ;;  %v708_v13 = vpop.f32.mrb[14].mxu0  ;;  %v600_v17 = vsel %vm398_vm4, %v577_v6, 0.0  ;;  %v546_v18 = vsel %vm398_vm4, %v370_v54, 0.0  ;;  %429 = vst.msk [vmem:[%s1096_s5 + $0x70] sm:$0xff] %vm398_vm4, %v725_v14  ;;  %v383_v20 = vpop.f32.mrb[13].mxu1  ;;  %v578_v24 = vmul.f32 %v370_v54, %v370_v54  ;;  %v580_v27 = vmul.f32 %v981_v49, %v981_v49 }
  0xf4   :  { %414 = vst.msk [vmem:[%s1095_s4 + $0x78] sm:$0xff] %vm398_vm4, %v708_v13  ;;  %v200_v19 = vpop.f32.mrb[15].mxu0  ;;  %v510_v21 = vsel %vm398_vm4, %v484_v63, 0.0  ;;  %v601_v22 = vadd.f32 %v600_v17, %v599_v7  ;;  %v547_v23 = vadd.f32 %v546_v18, %v545_v12  ;;  %427 = vst.msk [vmem:[%s1096_s5 + $0x60] sm:$0xff] %vm398_vm4, %v383_v20  ;;  %v726_v25 = vpop.f32.mrb[14].mxu1  ;;  %v509_v26 = vadd.f32 %v508_v60, %v507_v16 }
  0xf5   :  { %412 = vst.msk [vmem:[%s1095_s4 + $0x68] sm:$0xff] %vm398_vm4, %v200_v19  ;;  %v487_v28 = vmul.f32 %v707_v3, %v707_v3  ;;  %v454_v29 = vadd.f32 %v453_v4, %v452_v10  ;;  %430 = vst.msk [vmem:[%s1096_s5 + $0x78] sm:$0xff] %vm398_vm4, %v726_v25  ;;  %v386_v30 = vpop.f32.mrb[15].mxu1  ;;  %v602_v32 = vsel %vm398_vm4, %v578_v24, 0.0  ;;  %v455_v33 = vsel %vm398_vm4, %v197_v8, 0.0 }
  0xf6   :  { %v549_v31 = vadd.f32 %v548_v9, %v547_v23  ;;  %v485_v34 = vmul.f32 %v197_v8, %v197_v8  ;;  %428 = vst.msk [vmem:[%s1096_s5 + $0x68] sm:$0xff] %vm398_vm4, %v386_v30  ;;  %v603_v35 = vadd.f32 %v602_v32, %v601_v22  ;;  %v511_v37 = vadd.f32 %v510_v21, %v509_v26 }
  0xf7   :  { %v456_v36 = vadd.f32 %v455_v33, %v454_v29  ;;  %v604_v38 = vsel %vm398_vm4, %v579_v15, 0.0  ;;  %v550_v39 = vsel %vm398_vm4, %v981_v49, 0.0  ;;  %v459_v40 = vsel %vm398_vm4, %v707_v3, 0.0 }
  0xf8   :  { %v512_v41 = vsel %vm398_vm4, %v485_v34, 0.0  ;;  %v606_v42 = vsel %vm398_vm4, %v580_v27, 0.0  ;;  %v605_v43 = vadd.f32 %v604_v38, %v603_v35  ;;  %v457_v45 = vsel %vm398_vm4, %v200_v19, 0.0 }
  0xf9   :  { %v513_v44 = vadd.f32 %v512_v41, %v511_v37  ;;  %v516_v46 = vsel %vm398_vm4, %v487_v28, 0.0  ;;  %v458_v47 = vadd.f32 %v457_v45, %v456_v36  ;;  %v486_v48 = vmul.f32 %v200_v19, %v200_v19  ;;  %v472_v36 = vld [vmem:[%s1093_s6 + $0x1] sm:$0x1] }
  0xfa   :  { %v551_v50 = vadd.f32 %v550_v39, %v549_v31  ;;  %v488_v51 = vmul.f32 %v708_v13, %v708_v13  ;;  %v552_v52 = vsel %vm398_vm4, %v383_v20, 0.0  ;;  %v581_v53 = vmul.f32 %v383_v20, %v383_v20  ;;  %v528_v39 = vld [vmem:[%s1094_s7] sm:$0x1]  ;;  %v568_v45 = vld [vmem:[%s1094_s7 + $0x1] sm:$0x1] }
  0xfb   :  { %v607_v49 = vadd.f32 %v606_v42, %v605_v43  ;;  %v461_v54 = vsel %vm398_vm4, %v708_v13, 0.0  ;;  %v460_v55 = vadd.f32 %v459_v40, %v458_v47  ;;  %v514_v56 = vsel %vm398_vm4, %v486_v48, 0.0 }
  0xfc   :  { %v553_v57 = vadd.f32 %v552_v52, %v551_v50  ;;  %v583_v58 = vmul.f32 %v725_v14, %v725_v14  ;;  %v515_v59 = vadd.f32 %v514_v56, %v513_v44  ;;  %v608_v60 = vsel %vm398_vm4, %v581_v53, 0.0 }
  0xfd   :  { %v554_v61 = vsel %vm398_vm4, %v386_v30, 0.0  ;;  %v462_v62 = vadd.f32 %v461_v54, %v460_v55  ;;  %v609_v63 = vadd.f32 %v608_v60, %v607_v49  ;;  %v582_v1 = vmul.f32 %v386_v30, %v386_v30 }
  0xfe   :  { %v555_v0 = vadd.f32 %v554_v61, %v553_v57  ;;  %v518_v2 = vsel %vm398_vm4, %v488_v51, 0.0  ;;  %v556_v3 = vsel %vm398_vm4, %v725_v14, 0.0  ;;  %v517_v4 = vadd.f32 %v516_v46, %v515_v59 }
  0xff   :  { %v463_v5 = vrot.slane %v462_v62, 4  ;;  %v584_v6 = vmul.f32 %v726_v25, %v726_v25  ;;  %v610_v8 = vsel %vm398_vm4, %v582_v1, 0.0  ;;  %v558_v10 = vsel %vm398_vm4, %v726_v25, 0.0  ;;  %v431_v25 = vld [vmem:[%s1093_s6] sm:$0x1] }
 0x100   :  { %v557_v7 = vadd.f32 %v556_v3, %v555_v0  ;;  %v519_v9 = vadd.f32 %v518_v2, %v517_v4  ;;  %v611_v11 = vadd.f32 %v610_v8, %v609_v63  ;;  %v612_v12 = vsel %vm398_vm4, %v583_v58, 0.0 }
 0x101   :  { %v464_v13 = vadd.f32 %v463_v5, %v462_v62  ;;  %v614_v19 = vsel %vm398_vm4, %v584_v6, 0.0 }
 0x102   :  { %v559_v15 = vadd.f32 %v558_v10, %v557_v7  ;;  %v520_v16 = vrot.slane %v519_v9, 4  ;;  %v613_v17 = vadd.f32 %v612_v12, %v611_v11 }
 0x103   :  { %v465_v18 = vrot.slane %v464_v13, 2 }
 0x104   :  { %v560_v14 = vrot.slane %v559_v15, 4  ;;  %v521_v20 = vadd.f32 %v520_v16, %v519_v9  ;;  %v615_v21 = vadd.f32 %v614_v19, %v613_v17 }
 0x105   :  { %v466_v22 = vadd.f32 %v465_v18, %v464_v13 }
 0x106   :  { %v561_v23 = vadd.f32 %v560_v14, %v559_v15  ;;  %v522_v24 = vrot.slane %v521_v20, 2  ;;  %v616_v26 = vrot.slane %v615_v21, 4 }
 0x107   :  { %v467_v27 = vrot.slane %v466_v22, 1 }
 0x108   :  { %v562_v28 = vrot.slane %v561_v23, 2  ;;  %v523_v29 = vadd.f32 %v522_v24, %v521_v20  ;;  %v617_v30 = vadd.f32 %v616_v26, %v615_v21 }
 0x109   :  { %v468_v31 = vadd.f32 %v467_v27, %v466_v22 }
 0x10a   :  { %v563_v32 = vadd.f32 %v562_v28, %v561_v23  ;;  %v524_v33 = vrot.slane %v523_v29, 1  ;;  %v618_v34 = vrot.slane %v617_v30, 2 }
 0x10b   :  { %v469_v35 = vadd.f32 %v468_v31, %v431_v25 }
 0x10c   :  { %v564_v37 = vrot.slane %v563_v32, 1  ;;  %v525_v38 = vadd.f32 %v524_v33, %v523_v29  ;;  %v619_v40 = vadd.f32 %v618_v34, %v617_v30 }
 0x10d   :  { %471 = vst.msk [vmem:[%s1093_s6] sm:$0x1] %vm470_vm5, %v469_v35 }
 0x10e   :  { %v565_v41 = vadd.f32 %v564_v37, %v563_v32  ;;  %v526_v42 = vadd.f32 %v525_v38, %v472_v36  ;;  %v620_v43 = vrot.slane %v619_v40, 1 }
 0x110   :  { %v566_v44 = vadd.f32 %v565_v41, %v528_v39  ;;  %527 = vst.msk [vmem:[%s1093_s6 + $0x1] sm:$0x1] %vm470_vm5, %v526_v42  ;;  %v621_v46 = vadd.f32 %v620_v43, %v619_v40 }
 0x112   :  { %567 = vst.msk [vmem:[%s1094_s7] sm:$0x1] %vm470_vm5, %v566_v44  ;;  %v622_v47 = vadd.f32 %v621_v46, %v568_v45 }
 0x114   :  { %623 = vst.msk [vmem:[%s1094_s7 + $0x1] sm:$0x1] %vm470_vm5, %v622_v47 }

</bundles_post_ra>
